<compile_context>
chip_gen: v7x
topology: tpu7x:2x2x1
jax: 0.10.0
libtpu: 0.0.40
codegen_flags: <defaults>
</compile_context>

<pallas_src>
import numpy as np
import jax
import jax.numpy as jnp
from jax.experimental import pallas as pl
from jax.experimental.pallas import tpu as pltpu

DIM_IN = 32          # dim_in  (embed dim of the tracks)
HIDDEN = 64          # hidden_dim of the merger FFNs
NUM_HEADS = 8        # nn.MultiheadAttention(dim_in, 8, dropout)
DH = DIM_IN // NUM_HEADS
LN_EPS = 1e-5
SIG_EPS = 1e-5       # inverse_sigmoid eps
NEG_BIG = 1e30
OUT_W = 4 * DIM_IN   # 128-lane-dense kernel output


def _layer_norm(x, g, b):
    mu = jnp.mean(x, axis=-1, keepdims=True)
    var = jnp.mean((x - mu) ** 2, axis=-1, keepdims=True)
    return (x - mu) * jax.lax.rsqrt(var + LN_EPS) * g + b


def qim_kernel(x_ref, act_ref, wqkv_ref, wd_ref, wh_ref, vec_ref, out_ref):
    x = x_ref[...]                                   # (N, 96) = [qpos | qfeat | emb]
    n = x.shape[0]
    vec = vec_ref[...]                               # (16, 128): one vector per row, lane 0
    qpos = x[:, 0:DIM_IN]
    qfeat = x[:, DIM_IN:2 * DIM_IN]
    emb = x[:, 2 * DIM_IN:3 * DIM_IN]

    # additive key mask built in-kernel from the {0,1} active row (1 VPU op)
    kbias = (act_ref[...] - 1.0) * NEG_BIG           # (1, N): 0 active, -1e30 inactive

    # ---- fused QK / (Wv@Wo)-folded V' projection: one (N,64)x(64,320) matmul
    # q = k = query_pos + out_embed, value source = out_embed
    q = qpos + emb
    x2 = jnp.concatenate([q, emb], axis=-1)          # (N, 64)
    qkv = jnp.dot(x2, wqkv_ref[...], preferred_element_type=jnp.float32)   # (N, 320)
    vprime = qkv[:, 0:NUM_HEADS * DIM_IN]            # (N, 256) = [V'_0 | ... | V'_7]
    qk = qkv[:, NUM_HEADS * DIM_IN:] + vec[0:1, 0:2 * DIM_IN]   # (N, 64) = [Q | K] (+bq,bk)

    # per-head views (lane slices stacked along a new major axis; no reshapes)
    qh = jnp.stack([qk[:, h * DH:(h + 1) * DH] for h in range(NUM_HEADS)], axis=0)
    kh = jnp.stack([qk[:, DIM_IN + h * DH:DIM_IN + (h + 1) * DH]
                    for h in range(NUM_HEADS)], axis=0)                       # (8, N, 4)
    vh = jnp.stack([vprime[:, h * DIM_IN:(h + 1) * DIM_IN]
                    for h in range(NUM_HEADS)], axis=0)                       # (8, N, 32)

    # scores + masked softmax (dh=4 contraction kept on MXU; see perf note)
    s = jnp.einsum('hnd,hmd->hnm', qh, kh, preferred_element_type=jnp.float32)
    s = s * (1.0 / float(np.sqrt(DH))) + kbias.reshape(1, 1, n)
    s = s - jnp.max(s, axis=-1, keepdims=True)
    p = jnp.exp(s)
    p = p * pl.reciprocal(jnp.sum(p, axis=-1, keepdims=True), approx=True)

    # attention output with Wo already folded into V'; head-concat == sum over h
    ctx = jnp.einsum('hnm,hmo->hno', p, vh, preferred_element_type=jnp.float32)  # (8,N,32)
    tgt2 = jnp.sum(ctx, axis=0) + vec[2:3, 0:DIM_IN]  # + (bo + bv @ Wo)

    # tgt = norm1(out_embed + dropout1(tgt2))   (dropout = identity at inference)
    tgt = _layer_norm(emb + tgt2, vec[4:5, 0:DIM_IN], vec[5:6, 0:DIM_IN])

    # ---- FFN: tgt2 = linear2(relu(linear1(tgt)))
    wd = wd_ref[...]                                 # (32, 192) = [wp1 | wf1 | w1]
    wh = wh_ref[...]                                 # (128, 96) = [blockdiag(wp2,wf2) | w2]
    h1 = jnp.maximum(jnp.dot(tgt, wd[:, 2 * HIDDEN:3 * HIDDEN],
                             preferred_element_type=jnp.float32)
                     + vec[1:2, 0:HIDDEN], 0.0)
    tgt2b = jnp.dot(h1, wh[0:HIDDEN, 2 * DIM_IN:3 * DIM_IN],
                    preferred_element_type=jnp.float32) + vec[3:4, 0:DIM_IN]
    tgt = _layer_norm(tgt + tgt2b, vec[6:7, 0:DIM_IN], vec[7:8, 0:DIM_IN])

    # ---- fused update_query_pos / query_feat branches: lane-dense (N,128) matmul
    hpf = jnp.maximum(jnp.dot(tgt, wd[:, 0:2 * HIDDEN],
                              preferred_element_type=jnp.float32) + vec[8:9, :], 0.0)
    pf2 = jnp.dot(hpf, wh[:, 0:2 * DIM_IN],
                  preferred_element_type=jnp.float32) + vec[9:10, 0:2 * DIM_IN]
    qpos_new = _layer_norm(qpos + pf2[:, 0:DIM_IN],
                           vec[10:11, 0:DIM_IN], vec[11:12, 0:DIM_IN])
    qfeat_new = _layer_norm(qfeat + pf2[:, DIM_IN:2 * DIM_IN],
                            vec[12:13, 0:DIM_IN], vec[13:14, 0:DIM_IN])

    # lane-dense (N, 128) output: [query_pos_new | query_feat_new | pad]
    out_ref[...] = jnp.concatenate(
        [qpos_new, qfeat_new, jnp.zeros((n, 2 * DIM_IN), jnp.float32)], axis=-1)


def qim_update(x, active_row, packed_params):
    """Fused _update_track_embedding on a padded (NPAD, .) track slab."""
    n = x.shape[0]
    args = (x, active_row) + tuple(packed_params)
    vmem = pl.BlockSpec(memory_space=pltpu.MemorySpace.VMEM)
    # Gridless on purpose: ~100 KB working set, latency bound.  On v7x, batch
    # multiple frames into a leading "parallel" grid axis instead of splitting N.
    return pl.pallas_call(
        qim_kernel,
        out_shape=jax.ShapeDtypeStruct((n, OUT_W), jnp.float32),
        in_specs=[vmem] * len(args),
        out_specs=vmem,
    )(*args)


def _xavier(key, fan_in, fan_out):
    lim = float(np.sqrt(6.0 / (fan_in + fan_out)))
    # stored pre-transposed as (in, out) so the kernel does x @ W + b
    return jax.random.uniform(key, (fan_in, fan_out), jnp.float32, -lim, lim)


def make_params(key):
    ks = jax.random.split(key, 20)
    D, Hd = DIM_IN, HIDDEN
    small = lambda k, n: jax.random.uniform(k, (1, n), jnp.float32, -0.05, 0.05)
    ones = jnp.ones((1, D), jnp.float32)
    zeros = jnp.zeros((1, D), jnp.float32)
    return dict(
        wq=_xavier(ks[0], D, D), wk=_xavier(ks[1], D, D), wv=_xavier(ks[2], D, D),
        bq=small(ks[3], D), bk=small(ks[4], D), bv=small(ks[5], D),
        wo=_xavier(ks[6], D, D), bo=small(ks[7], D),
        w1=_xavier(ks[8], D, Hd), b1=small(ks[9], Hd),
        w2=_xavier(ks[10], Hd, D), b2=small(ks[11], D),
        wp1=_xavier(ks[12], D, Hd), bp1=small(ks[13], Hd),
        wp2=_xavier(ks[14], Hd, D), bp2=small(ks[15], D),
        wf1=_xavier(ks[16], D, Hd), bf1=small(ks[17], Hd),
        wf2=_xavier(ks[18], Hd, D), bf2=small(ks[19], D),
        g1=ones, be1=zeros, g2=ones, be2=zeros,
        gp=ones, bep=zeros, gf=ones, bef=zeros,
    )


def pack_params(p):
    """Pack the 28 per-layer tensors into 4 contiguous slabs (one DMA each)."""
    D, Hd, H = DIM_IN, HIDDEN, NUM_HEADS

    # Fused QKV' weight (64, 320), block diagonal, laid out so both kernel
    # slices are 128-lane aligned: cols [0,256) = [Wv_0@Wo_0 | ... | Wv_7@Wo_7]
    # driven by emb, cols [256,320) = [Wq | Wk] driven by q.
    wvo = jnp.concatenate(
        [p['wv'][:, h * DH:(h + 1) * DH] @ p['wo'][h * DH:(h + 1) * DH, :]
         for h in range(H)], axis=-1)                                     # (32, 256)
    w_qkv = jnp.zeros((2 * D, H * D + 2 * D), jnp.float32)                # (64, 320)
    w_qkv = w_qkv.at[D:2 * D, 0:H * D].set(wvo)
    w_qkv = w_qkv.at[0:D, H * D:H * D + D].set(p['wq'])
    w_qkv = w_qkv.at[0:D, H * D + D:H * D + 2 * D].set(p['wk'])

    # hidden-layer weights: cols [0,128) = [wp1 | wf1] (aligned for the (N,128)
    # branch matmul), cols [128,192) = w1 (starts on a 128-lane boundary).
    w_d = jnp.concatenate([p['wp1'], p['wf1'], p['w1']], axis=-1)         # (32, 192)

    # second-layer weights: cols [0,64) = blockdiag(wp2, wf2), cols [64,96) = w2.
    w_h = jnp.zeros((2 * Hd, 3 * D), jnp.float32)                         # (128, 96)
    w_h = w_h.at[0:Hd, 0:D].set(p['wp2'])
    w_h = w_h.at[Hd:2 * Hd, D:2 * D].set(p['wf2'])
    w_h = w_h.at[0:Hd, 2 * D:3 * D].set(p['w2'])

    # bias / LayerNorm vector slab: one logical vector per row, lane offset 0.
    vec = jnp.zeros((16, 128), jnp.float32)
    vec = vec.at[0, 0:D].set(p['bq'][0]);    vec = vec.at[0, D:2 * D].set(p['bk'][0])
    vec = vec.at[1, 0:Hd].set(p['b1'][0])
    vec = vec.at[2, 0:D].set((p['bo'] + p['bv'] @ p['wo'])[0])            # bo + bv@Wo
    vec = vec.at[3, 0:D].set(p['b2'][0])
    vec = vec.at[4, 0:D].set(p['g1'][0]);    vec = vec.at[5, 0:D].set(p['be1'][0])
    vec = vec.at[6, 0:D].set(p['g2'][0]);    vec = vec.at[7, 0:D].set(p['be2'][0])
    vec = vec.at[8, 0:Hd].set(p['bp1'][0]);  vec = vec.at[8, Hd:2 * Hd].set(p['bf1'][0])
    vec = vec.at[9, 0:D].set(p['bp2'][0]);   vec = vec.at[9, D:2 * D].set(p['bf2'][0])
    vec = vec.at[10, 0:D].set(p['gp'][0]);   vec = vec.at[11, 0:D].set(p['bep'][0])
    vec = vec.at[12, 0:D].set(p['gf'][0]);   vec = vec.at[13, 0:D].set(p['bef'][0])
    return (w_qkv, w_d, w_h, vec)


if __name__ == "__main__":
    key = jax.random.PRNGKey(0)
    k_param, kd0, kd1, kd2, kd3 = jax.random.split(key, 5)

    # Synthetic "track_instances" fields (inference branch of the forward).
    n_tracks = 24
    n_init = 8
    query_pos_full = jax.random.normal(kd0, (n_tracks, 2 * DIM_IN), jnp.float32)
    out_embed = jax.random.normal(kd1, (n_tracks, DIM_IN), jnp.float32)
    pred_boxes = jax.nn.sigmoid(jax.random.normal(kd2, (n_tracks, 4), jnp.float32))
    init_query_pos = jax.random.normal(kd3, (n_init, 2 * DIM_IN), jnp.float32)
    # deterministic obj_idxes: every 3rd track is inactive (-1)
    obj_idxes = jnp.where(jnp.arange(n_tracks) % 3 != 0, jnp.arange(n_tracks), -1)

    packed = pack_params(make_params(k_param))

    # Bucketed capacity (multiple of 8): one compiled kernel for any active count.
    NPAD = ((n_tracks + 7) // 8) * 8

    @jax.jit
    def forward(query_pos_full, out_embed, pred_boxes, obj_idxes, packed):
        # _select_active_tracks (eval): the kernel gets the raw {0,1} active row
        # and builds the additive key mask itself (no where() in front of the call).
        active = obj_idxes >= 0
        pad = NPAD - query_pos_full.shape[0]
        x = jnp.concatenate([query_pos_full, out_embed], axis=-1)     # (n, 96)
        x = jnp.pad(x, ((0, pad), (0, 0)))
        active_row = jnp.pad(active, (0, pad)).astype(jnp.float32)[None, :]   # (1, NPAD)

        out128 = qim_update(x, active_row, packed)                    # (NPAD, 128)
        out64 = out128[:query_pos_full.shape[0], :2 * DIM_IN]

        # ref_pts = inverse_sigmoid(pred_boxes[:, :2]) — no network dependence,
        # hoisted out of the kernel into plain XLA.
        xy = jnp.clip(pred_boxes[:, :2], 0.0, 1.0)
        ref_pts = jnp.log(jnp.maximum(xy, SIG_EPS) / jnp.maximum(1.0 - xy, SIG_EPS))
        return out64, ref_pts, active

    new_query_pos, ref_pts_all, active = forward(
        query_pos_full, out_embed, pred_boxes, obj_idxes, packed)
    jax.block_until_ready((new_query_pos, ref_pts_all, active))

    # Instances.cat([init_track_instances, active_track_instances]) — dynamic-shape
    # bookkeeping stays as host glue (only post-kernel sync in the pipeline).
    # TODO(synk): training-only random_drop / _add_fp_tracks (bernoulli + IoU matching
    # over dynamic-length Instances) have no static-shape Pallas form.
    mask_np = np.asarray(active)
    updated_active = np.asarray(new_query_pos)[mask_np]               # (n_active, 64)
    ref_pts = np.asarray(ref_pts_all)[mask_np]                        # (n_active, 2)
    merged_query_pos = jnp.concatenate(
        [init_query_pos, jnp.asarray(updated_active)], axis=0)

    jax.block_until_ready(merged_query_pos)
    n_active = int(mask_np.sum())
    assert merged_query_pos.shape == (n_init + n_active, 2 * DIM_IN)
    assert ref_pts.shape == (n_active, 2)
    assert bool(jnp.all(jnp.isfinite(merged_query_pos)))
    print("KERNEL_OK")
</pallas_src>

<mosaic_0001>
module attributes {stable_mosaic.version = 11 : i64} {
  func.func @qim_kernel(%arg0: memref<24x96xf32, #tpu.memory_space<vmem>>, %arg1: memref<1x24xf32, #tpu.memory_space<vmem>>, %arg2: memref<64x320xf32, #tpu.memory_space<vmem>>, %arg3: memref<32x192xf32, #tpu.memory_space<vmem>>, %arg4: memref<128x96xf32, #tpu.memory_space<vmem>>, %arg5: memref<16x128xf32, #tpu.memory_space<vmem>>, %arg6: memref<24x128xf32, #tpu.memory_space<vmem>>) attributes {dimension_semantics = [], scalar_prefetch = 0 : i64, scratch_operands = 0 : i64, tpu.core_type = #tpu.core_type<tc>} {
    %c0 = arith.constant 0 : index
    %c0_0 = arith.constant 0 : index
    %0 = vector.load %arg0[%c0, %c0_0] : memref<24x96xf32, #tpu.memory_space<vmem>>, vector<24x96xf32>
    %c0_1 = arith.constant 0 : index
    %c0_2 = arith.constant 0 : index
    %1 = vector.load %arg5[%c0_1, %c0_2] : memref<16x128xf32, #tpu.memory_space<vmem>>, vector<16x128xf32>
    %2 = vector.extract_strided_slice %0 {offsets = [0, 0], sizes = [24, 32], strides = [1, 1]} : vector<24x96xf32> to vector<24x32xf32>
    %3 = vector.extract_strided_slice %0 {offsets = [0, 32], sizes = [24, 32], strides = [1, 1]} : vector<24x96xf32> to vector<24x32xf32>
    %4 = vector.extract_strided_slice %0 {offsets = [0, 64], sizes = [24, 32], strides = [1, 1]} : vector<24x96xf32> to vector<24x32xf32>
    %c0_3 = arith.constant 0 : index
    %c0_4 = arith.constant 0 : index
    %5 = vector.load %arg1[%c0_3, %c0_4] : memref<1x24xf32, #tpu.memory_space<vmem>>, vector<1x24xf32>
    %cst = arith.constant 1.000000e+00 : f32
    %6 = vector.broadcast %cst : f32 to vector<1x24xf32>
    %7 = arith.subf %5, %6 : vector<1x24xf32>
    %cst_5 = arith.constant 1.000000e+30 : f32
    %8 = vector.broadcast %cst_5 : f32 to vector<1x24xf32>
    %9 = arith.mulf %7, %8 : vector<1x24xf32>
    %10 = arith.addf %2, %4 : vector<24x32xf32>
    %11 = tpu.concatenate %10, %4 in 1 : vector<24x32xf32>, vector<24x32xf32> -> vector<24x64xf32>
    %c0_6 = arith.constant 0 : index
    %c0_7 = arith.constant 0 : index
    %12 = vector.load %arg2[%c0_6, %c0_7] : memref<64x320xf32, #tpu.memory_space<vmem>>, vector<64x320xf32>
    %cst_8 = arith.constant dense<0.000000e+00> : vector<24x320xf32>
    %13 = tpu.matmul %11, %12, %cst_8 {dimension_numbers = #tpu.dot_dimension_numbers<[1], [0], [0], [1], [0, 0, 1, 1], [], []>} : vector<24x64xf32>, vector<64x320xf32>, vector<24x320xf32> -> vector<24x320xf32>
    %14 = vector.extract_strided_slice %13 {offsets = [0, 0], sizes = [24, 256], strides = [1, 1]} : vector<24x320xf32> to vector<24x256xf32>
    %15 = vector.extract_strided_slice %13 {offsets = [0, 256], sizes = [24, 64], strides = [1, 1]} : vector<24x320xf32> to vector<24x64xf32>
    %16 = vector.extract_strided_slice %1 {offsets = [0, 0], sizes = [1, 64], strides = [1, 1]} : vector<16x128xf32> to vector<1x64xf32>
    %17 = vector.broadcast %16 : vector<1x64xf32> to vector<24x64xf32>
    %18 = arith.addf %15, %17 : vector<24x64xf32>
    %19 = vector.extract_strided_slice %18 {offsets = [0, 0], sizes = [24, 4], strides = [1, 1]} : vector<24x64xf32> to vector<24x4xf32>
    %20 = vector.extract_strided_slice %18 {offsets = [0, 4], sizes = [24, 4], strides = [1, 1]} : vector<24x64xf32> to vector<24x4xf32>
    %21 = vector.extract_strided_slice %18 {offsets = [0, 8], sizes = [24, 4], strides = [1, 1]} : vector<24x64xf32> to vector<24x4xf32>
    %22 = vector.extract_strided_slice %18 {offsets = [0, 12], sizes = [24, 4], strides = [1, 1]} : vector<24x64xf32> to vector<24x4xf32>
    %23 = vector.extract_strided_slice %18 {offsets = [0, 16], sizes = [24, 4], strides = [1, 1]} : vector<24x64xf32> to vector<24x4xf32>
    %24 = vector.extract_strided_slice %18 {offsets = [0, 20], sizes = [24, 4], strides = [1, 1]} : vector<24x64xf32> to vector<24x4xf32>
    %25 = vector.extract_strided_slice %18 {offsets = [0, 24], sizes = [24, 4], strides = [1, 1]} : vector<24x64xf32> to vector<24x4xf32>
    %26 = vector.extract_strided_slice %18 {offsets = [0, 28], sizes = [24, 4], strides = [1, 1]} : vector<24x64xf32> to vector<24x4xf32>
    %27 = vector.shape_cast %19 : vector<24x4xf32> to vector<1x24x4xf32>
    %28 = vector.shape_cast %20 : vector<24x4xf32> to vector<1x24x4xf32>
    %29 = vector.shape_cast %21 : vector<24x4xf32> to vector<1x24x4xf32>
    %30 = vector.shape_cast %22 : vector<24x4xf32> to vector<1x24x4xf32>
    %31 = vector.shape_cast %23 : vector<24x4xf32> to vector<1x24x4xf32>
    %32 = vector.shape_cast %24 : vector<24x4xf32> to vector<1x24x4xf32>
    %33 = vector.shape_cast %25 : vector<24x4xf32> to vector<1x24x4xf32>
    %34 = vector.shape_cast %26 : vector<24x4xf32> to vector<1x24x4xf32>
    %35 = tpu.concatenate %27, %28, %29, %30, %31, %32, %33, %34 in 0 : vector<1x24x4xf32>, vector<1x24x4xf32>, vector<1x24x4xf32>, vector<1x24x4xf32>, vector<1x24x4xf32>, vector<1x24x4xf32>, vector<1x24x4xf32>, vector<1x24x4xf32> -> vector<8x24x4xf32>
    %36 = vector.extract_strided_slice %18 {offsets = [0, 32], sizes = [24, 4], strides = [1, 1]} : vector<24x64xf32> to vector<24x4xf32>
    %37 = vector.extract_strided_slice %18 {offsets = [0, 36], sizes = [24, 4], strides = [1, 1]} : vector<24x64xf32> to vector<24x4xf32>
    %38 = vector.extract_strided_slice %18 {offsets = [0, 40], sizes = [24, 4], strides = [1, 1]} : vector<24x64xf32> to vector<24x4xf32>
    %39 = vector.extract_strided_slice %18 {offsets = [0, 44], sizes = [24, 4], strides = [1, 1]} : vector<24x64xf32> to vector<24x4xf32>
    %40 = vector.extract_strided_slice %18 {offsets = [0, 48], sizes = [24, 4], strides = [1, 1]} : vector<24x64xf32> to vector<24x4xf32>
    %41 = vector.extract_strided_slice %18 {offsets = [0, 52], sizes = [24, 4], strides = [1, 1]} : vector<24x64xf32> to vector<24x4xf32>
    %42 = vector.extract_strided_slice %18 {offsets = [0, 56], sizes = [24, 4], strides = [1, 1]} : vector<24x64xf32> to vector<24x4xf32>
    %43 = vector.extract_strided_slice %18 {offsets = [0, 60], sizes = [24, 4], strides = [1, 1]} : vector<24x64xf32> to vector<24x4xf32>
    %44 = vector.shape_cast %36 : vector<24x4xf32> to vector<1x24x4xf32>
    %45 = vector.shape_cast %37 : vector<24x4xf32> to vector<1x24x4xf32>
    %46 = vector.shape_cast %38 : vector<24x4xf32> to vector<1x24x4xf32>
    %47 = vector.shape_cast %39 : vector<24x4xf32> to vector<1x24x4xf32>
    %48 = vector.shape_cast %40 : vector<24x4xf32> to vector<1x24x4xf32>
    %49 = vector.shape_cast %41 : vector<24x4xf32> to vector<1x24x4xf32>
    %50 = vector.shape_cast %42 : vector<24x4xf32> to vector<1x24x4xf32>
    %51 = vector.shape_cast %43 : vector<24x4xf32> to vector<1x24x4xf32>
    %52 = tpu.concatenate %44, %45, %46, %47, %48, %49, %50, %51 in 0 : vector<1x24x4xf32>, vector<1x24x4xf32>, vector<1x24x4xf32>, vector<1x24x4xf32>, vector<1x24x4xf32>, vector<1x24x4xf32>, vector<1x24x4xf32>, vector<1x24x4xf32> -> vector<8x24x4xf32>
    %53 = vector.extract_strided_slice %14 {offsets = [0, 0], sizes = [24, 32], strides = [1, 1]} : vector<24x256xf32> to vector<24x32xf32>
    %54 = vector.extract_strided_slice %14 {offsets = [0, 32], sizes = [24, 32], strides = [1, 1]} : vector<24x256xf32> to vector<24x32xf32>
    %55 = vector.extract_strided_slice %14 {offsets = [0, 64], sizes = [24, 32], strides = [1, 1]} : vector<24x256xf32> to vector<24x32xf32>
    %56 = vector.extract_strided_slice %14 {offsets = [0, 96], sizes = [24, 32], strides = [1, 1]} : vector<24x256xf32> to vector<24x32xf32>
    %57 = vector.extract_strided_slice %14 {offsets = [0, 128], sizes = [24, 32], strides = [1, 1]} : vector<24x256xf32> to vector<24x32xf32>
    %58 = vector.extract_strided_slice %14 {offsets = [0, 160], sizes = [24, 32], strides = [1, 1]} : vector<24x256xf32> to vector<24x32xf32>
    %59 = vector.extract_strided_slice %14 {offsets = [0, 192], sizes = [24, 32], strides = [1, 1]} : vector<24x256xf32> to vector<24x32xf32>
    %60 = vector.extract_strided_slice %14 {offsets = [0, 224], sizes = [24, 32], strides = [1, 1]} : vector<24x256xf32> to vector<24x32xf32>
    %61 = vector.shape_cast %53 : vector<24x32xf32> to vector<1x24x32xf32>
    %62 = vector.shape_cast %54 : vector<24x32xf32> to vector<1x24x32xf32>
    %63 = vector.shape_cast %55 : vector<24x32xf32> to vector<1x24x32xf32>
    %64 = vector.shape_cast %56 : vector<24x32xf32> to vector<1x24x32xf32>
    %65 = vector.shape_cast %57 : vector<24x32xf32> to vector<1x24x32xf32>
    %66 = vector.shape_cast %58 : vector<24x32xf32> to vector<1x24x32xf32>
    %67 = vector.shape_cast %59 : vector<24x32xf32> to vector<1x24x32xf32>
    %68 = vector.shape_cast %60 : vector<24x32xf32> to vector<1x24x32xf32>
    %69 = tpu.concatenate %61, %62, %63, %64, %65, %66, %67, %68 in 0 : vector<1x24x32xf32>, vector<1x24x32xf32>, vector<1x24x32xf32>, vector<1x24x32xf32>, vector<1x24x32xf32>, vector<1x24x32xf32>, vector<1x24x32xf32>, vector<1x24x32xf32> -> vector<8x24x32xf32>
    "tpu.trace_start"() <{level = 10 : i32, message = "hnd,hmd->hnm"}> : () -> ()
    %cst_9 = arith.constant dense<0.000000e+00> : vector<8x24x24xf32>
    %70 = tpu.matmul %35, %52, %cst_9 {dimension_numbers = #tpu.dot_dimension_numbers<[2], [2], [1], [1], [0, 0, 0, 1, 1, 1], [0], [0]>} : vector<8x24x4xf32>, vector<8x24x4xf32>, vector<8x24x24xf32> -> vector<8x24x24xf32>
    "tpu.trace_stop"() : () -> ()
    %cst_10 = arith.constant 5.000000e-01 : f32
    %71 = vector.broadcast %cst_10 : f32 to vector<8x24x24xf32>
    %72 = arith.mulf %70, %71 : vector<8x24x24xf32>
    %73 = vector.shape_cast %9 : vector<1x24xf32> to vector<1x1x24xf32>
    %74 = vector.broadcast %73 : vector<1x1x24xf32> to vector<8x24x24xf32>
    %75 = arith.addf %72, %74 : vector<8x24x24xf32>
    %cst_11 = arith.constant dense<0xFF800000> : vector<8x24xf32>
    %76 = vector.multi_reduction <maximumf>, %75, %cst_11 [2] : vector<8x24x24xf32> to vector<8x24xf32>
    %77 = vector.shape_cast %76 : vector<8x24xf32> to vector<8x24x1xf32>
    %78 = vector.broadcast %77 : vector<8x24x1xf32> to vector<8x24x24xf32>
    %79 = arith.subf %75, %78 : vector<8x24x24xf32>
    %80 = math.exp %79 : vector<8x24x24xf32>
    %cst_12 = arith.constant dense<0.000000e+00> : vector<8x24xf32>
    %81 = vector.multi_reduction <add>, %80, %cst_12 [2] : vector<8x24x24xf32> to vector<8x24xf32>
    %82 = vector.shape_cast %81 : vector<8x24xf32> to vector<8x24x1xf32>
    %83 = tpu.reciprocal %82 {approx = true} : vector<8x24x1xf32> -> vector<8x24x1xf32>
    %84 = vector.broadcast %83 : vector<8x24x1xf32> to vector<8x24x24xf32>
    %85 = arith.mulf %80, %84 : vector<8x24x24xf32>
    "tpu.trace_start"() <{level = 10 : i32, message = "hnm,hmo->hno"}> : () -> ()
    %cst_13 = arith.constant dense<0.000000e+00> : vector<8x24x32xf32>
    %86 = tpu.matmul %85, %69, %cst_13 {dimension_numbers = #tpu.dot_dimension_numbers<[2], [1], [1], [2], [0, 0, 0, 1, 1, 2], [0], [0]>} : vector<8x24x24xf32>, vector<8x24x32xf32>, vector<8x24x32xf32> -> vector<8x24x32xf32>
    "tpu.trace_stop"() : () -> ()
    %cst_14 = arith.constant dense<0.000000e+00> : vector<24x32xf32>
    %87 = vector.multi_reduction <add>, %86, %cst_14 [0] : vector<8x24x32xf32> to vector<24x32xf32>
    %88 = vector.extract_strided_slice %1 {offsets = [2, 0], sizes = [1, 32], strides = [1, 1]} : vector<16x128xf32> to vector<1x32xf32>
    %89 = vector.broadcast %88 : vector<1x32xf32> to vector<24x32xf32>
    %90 = arith.addf %87, %89 : vector<24x32xf32>
    %91 = arith.addf %4, %90 : vector<24x32xf32>
    %92 = vector.extract_strided_slice %1 {offsets = [4, 0], sizes = [1, 32], strides = [1, 1]} : vector<16x128xf32> to vector<1x32xf32>
    %93 = vector.extract_strided_slice %1 {offsets = [5, 0], sizes = [1, 32], strides = [1, 1]} : vector<16x128xf32> to vector<1x32xf32>
    %cst_15 = arith.constant dense<0.000000e+00> : vector<24xf32>
    %94 = vector.multi_reduction <add>, %91, %cst_15 [1] : vector<24x32xf32> to vector<24xf32>
    %95 = vector.shape_cast %94 : vector<24xf32> to vector<24x1xf32>
    %cst_16 = arith.constant 3.200000e+01 : f32
    %96 = vector.broadcast %cst_16 : f32 to vector<24x1xf32>
    %97 = arith.divf %95, %96 : vector<24x1xf32>
    %98 = vector.broadcast %97 : vector<24x1xf32> to vector<24x32xf32>
    %99 = arith.subf %91, %98 : vector<24x32xf32>
    %100 = arith.mulf %99, %99 : vector<24x32xf32>
    %cst_17 = arith.constant dense<0.000000e+00> : vector<24xf32>
    %101 = vector.multi_reduction <add>, %100, %cst_17 [1] : vector<24x32xf32> to vector<24xf32>
    %102 = vector.shape_cast %101 : vector<24xf32> to vector<24x1xf32>
    %cst_18 = arith.constant 3.200000e+01 : f32
    %103 = vector.broadcast %cst_18 : f32 to vector<24x1xf32>
    %104 = arith.divf %102, %103 : vector<24x1xf32>
    %105 = vector.broadcast %97 : vector<24x1xf32> to vector<24x32xf32>
    %106 = arith.subf %91, %105 : vector<24x32xf32>
    %cst_19 = arith.constant 9.99999974E-6 : f32
    %107 = vector.broadcast %cst_19 : f32 to vector<24x1xf32>
    %108 = arith.addf %104, %107 : vector<24x1xf32>
    %109 = math.rsqrt %108 : vector<24x1xf32>
    %110 = vector.broadcast %109 : vector<24x1xf32> to vector<24x32xf32>
    %111 = arith.mulf %106, %110 : vector<24x32xf32>
    %112 = vector.broadcast %92 : vector<1x32xf32> to vector<24x32xf32>
    %113 = arith.mulf %111, %112 : vector<24x32xf32>
    %114 = vector.broadcast %93 : vector<1x32xf32> to vector<24x32xf32>
    %115 = arith.addf %113, %114 : vector<24x32xf32>
    %c0_20 = arith.constant 0 : index
    %c0_21 = arith.constant 0 : index
    %116 = vector.load %arg3[%c0_20, %c0_21] : memref<32x192xf32, #tpu.memory_space<vmem>>, vector<32x192xf32>
    %c0_22 = arith.constant 0 : index
    %c0_23 = arith.constant 0 : index
    %117 = vector.load %arg4[%c0_22, %c0_23] : memref<128x96xf32, #tpu.memory_space<vmem>>, vector<128x96xf32>
    %118 = vector.extract_strided_slice %116 {offsets = [0, 128], sizes = [32, 64], strides = [1, 1]} : vector<32x192xf32> to vector<32x64xf32>
    %cst_24 = arith.constant dense<0.000000e+00> : vector<24x64xf32>
    %119 = tpu.matmul %115, %118, %cst_24 {dimension_numbers = #tpu.dot_dimension_numbers<[1], [0], [0], [1], [0, 0, 1, 1], [], []>} : vector<24x32xf32>, vector<32x64xf32>, vector<24x64xf32> -> vector<24x64xf32>
    %120 = vector.extract_strided_slice %1 {offsets = [1, 0], sizes = [1, 64], strides = [1, 1]} : vector<16x128xf32> to vector<1x64xf32>
    %121 = vector.broadcast %120 : vector<1x64xf32> to vector<24x64xf32>
    %122 = arith.addf %119, %121 : vector<24x64xf32>
    %cst_25 = arith.constant 0.000000e+00 : f32
    %123 = vector.broadcast %cst_25 : f32 to vector<24x64xf32>
    %124 = arith.maximumf %122, %123 : vector<24x64xf32>
    %125 = vector.extract_strided_slice %117 {offsets = [0, 64], sizes = [64, 32], strides = [1, 1]} : vector<128x96xf32> to vector<64x32xf32>
    %cst_26 = arith.constant dense<0.000000e+00> : vector<24x32xf32>
    %126 = tpu.matmul %124, %125, %cst_26 {dimension_numbers = #tpu.dot_dimension_numbers<[1], [0], [0], [1], [0, 0, 1, 1], [], []>} : vector<24x64xf32>, vector<64x32xf32>, vector<24x32xf32> -> vector<24x32xf32>
    %127 = vector.extract_strided_slice %1 {offsets = [3, 0], sizes = [1, 32], strides = [1, 1]} : vector<16x128xf32> to vector<1x32xf32>
    %128 = vector.broadcast %127 : vector<1x32xf32> to vector<24x32xf32>
    %129 = arith.addf %126, %128 : vector<24x32xf32>
    %130 = arith.addf %115, %129 : vector<24x32xf32>
    %131 = vector.extract_strided_slice %1 {offsets = [6, 0], sizes = [1, 32], strides = [1, 1]} : vector<16x128xf32> to vector<1x32xf32>
    %132 = vector.extract_strided_slice %1 {offsets = [7, 0], sizes = [1, 32], strides = [1, 1]} : vector<16x128xf32> to vector<1x32xf32>
    %cst_27 = arith.constant dense<0.000000e+00> : vector<24xf32>
    %133 = vector.multi_reduction <add>, %130, %cst_27 [1] : vector<24x32xf32> to vector<24xf32>
    %134 = vector.shape_cast %133 : vector<24xf32> to vector<24x1xf32>
    %cst_28 = arith.constant 3.200000e+01 : f32
    %135 = vector.broadcast %cst_28 : f32 to vector<24x1xf32>
    %136 = arith.divf %134, %135 : vector<24x1xf32>
    %137 = vector.broadcast %136 : vector<24x1xf32> to vector<24x32xf32>
    %138 = arith.subf %130, %137 : vector<24x32xf32>
    %139 = arith.mulf %138, %138 : vector<24x32xf32>
    %cst_29 = arith.constant dense<0.000000e+00> : vector<24xf32>
    %140 = vector.multi_reduction <add>, %139, %cst_29 [1] : vector<24x32xf32> to vector<24xf32>
    %141 = vector.shape_cast %140 : vector<24xf32> to vector<24x1xf32>
    %cst_30 = arith.constant 3.200000e+01 : f32
    %142 = vector.broadcast %cst_30 : f32 to vector<24x1xf32>
    %143 = arith.divf %141, %142 : vector<24x1xf32>
    %144 = vector.broadcast %136 : vector<24x1xf32> to vector<24x32xf32>
    %145 = arith.subf %130, %144 : vector<24x32xf32>
    %cst_31 = arith.constant 9.99999974E-6 : f32
    %146 = vector.broadcast %cst_31 : f32 to vector<24x1xf32>
    %147 = arith.addf %143, %146 : vector<24x1xf32>
    %148 = math.rsqrt %147 : vector<24x1xf32>
    %149 = vector.broadcast %148 : vector<24x1xf32> to vector<24x32xf32>
    %150 = arith.mulf %145, %149 : vector<24x32xf32>
    %151 = vector.broadcast %131 : vector<1x32xf32> to vector<24x32xf32>
    %152 = arith.mulf %150, %151 : vector<24x32xf32>
    %153 = vector.broadcast %132 : vector<1x32xf32> to vector<24x32xf32>
    %154 = arith.addf %152, %153 : vector<24x32xf32>
    %155 = vector.extract_strided_slice %116 {offsets = [0, 0], sizes = [32, 128], strides = [1, 1]} : vector<32x192xf32> to vector<32x128xf32>
    %cst_32 = arith.constant dense<0.000000e+00> : vector<24x128xf32>
    %156 = tpu.matmul %154, %155, %cst_32 {dimension_numbers = #tpu.dot_dimension_numbers<[1], [0], [0], [1], [0, 0, 1, 1], [], []>} : vector<24x32xf32>, vector<32x128xf32>, vector<24x128xf32> -> vector<24x128xf32>
    %157 = vector.extract_strided_slice %1 {offsets = [8, 0], sizes = [1, 128], strides = [1, 1]} : vector<16x128xf32> to vector<1x128xf32>
    %158 = vector.broadcast %157 : vector<1x128xf32> to vector<24x128xf32>
    %159 = arith.addf %156, %158 : vector<24x128xf32>
    %cst_33 = arith.constant 0.000000e+00 : f32
    %160 = vector.broadcast %cst_33 : f32 to vector<24x128xf32>
    %161 = arith.maximumf %159, %160 : vector<24x128xf32>
    %162 = vector.extract_strided_slice %117 {offsets = [0, 0], sizes = [128, 64], strides = [1, 1]} : vector<128x96xf32> to vector<128x64xf32>
    %cst_34 = arith.constant dense<0.000000e+00> : vector<24x64xf32>
    %163 = tpu.matmul %161, %162, %cst_34 {dimension_numbers = #tpu.dot_dimension_numbers<[1], [0], [0], [1], [0, 0, 1, 1], [], []>} : vector<24x128xf32>, vector<128x64xf32>, vector<24x64xf32> -> vector<24x64xf32>
    %164 = vector.extract_strided_slice %1 {offsets = [9, 0], sizes = [1, 64], strides = [1, 1]} : vector<16x128xf32> to vector<1x64xf32>
    %165 = vector.broadcast %164 : vector<1x64xf32> to vector<24x64xf32>
    %166 = arith.addf %163, %165 : vector<24x64xf32>
    %167 = vector.extract_strided_slice %166 {offsets = [0, 0], sizes = [24, 32], strides = [1, 1]} : vector<24x64xf32> to vector<24x32xf32>
    %168 = arith.addf %2, %167 : vector<24x32xf32>
    %169 = vector.extract_strided_slice %1 {offsets = [10, 0], sizes = [1, 32], strides = [1, 1]} : vector<16x128xf32> to vector<1x32xf32>
    %170 = vector.extract_strided_slice %1 {offsets = [11, 0], sizes = [1, 32], strides = [1, 1]} : vector<16x128xf32> to vector<1x32xf32>
    %cst_35 = arith.constant dense<0.000000e+00> : vector<24xf32>
    %171 = vector.multi_reduction <add>, %168, %cst_35 [1] : vector<24x32xf32> to vector<24xf32>
    %172 = vector.shape_cast %171 : vector<24xf32> to vector<24x1xf32>
    %cst_36 = arith.constant 3.200000e+01 : f32
    %173 = vector.broadcast %cst_36 : f32 to vector<24x1xf32>
    %174 = arith.divf %172, %173 : vector<24x1xf32>
    %175 = vector.broadcast %174 : vector<24x1xf32> to vector<24x32xf32>
    %176 = arith.subf %168, %175 : vector<24x32xf32>
    %177 = arith.mulf %176, %176 : vector<24x32xf32>
    %cst_37 = arith.constant dense<0.000000e+00> : vector<24xf32>
    %178 = vector.multi_reduction <add>, %177, %cst_37 [1] : vector<24x32xf32> to vector<24xf32>
    %179 = vector.shape_cast %178 : vector<24xf32> to vector<24x1xf32>
    %cst_38 = arith.constant 3.200000e+01 : f32
    %180 = vector.broadcast %cst_38 : f32 to vector<24x1xf32>
    %181 = arith.divf %179, %180 : vector<24x1xf32>
    %182 = vector.broadcast %174 : vector<24x1xf32> to vector<24x32xf32>
    %183 = arith.subf %168, %182 : vector<24x32xf32>
    %cst_39 = arith.constant 9.99999974E-6 : f32
    %184 = vector.broadcast %cst_39 : f32 to vector<24x1xf32>
    %185 = arith.addf %181, %184 : vector<24x1xf32>
    %186 = math.rsqrt %185 : vector<24x1xf32>
    %187 = vector.broadcast %186 : vector<24x1xf32> to vector<24x32xf32>
    %188 = arith.mulf %183, %187 : vector<24x32xf32>
    %189 = vector.broadcast %169 : vector<1x32xf32> to vector<24x32xf32>
    %190 = arith.mulf %188, %189 : vector<24x32xf32>
    %191 = vector.broadcast %170 : vector<1x32xf32> to vector<24x32xf32>
    %192 = arith.addf %190, %191 : vector<24x32xf32>
    %193 = vector.extract_strided_slice %166 {offsets = [0, 32], sizes = [24, 32], strides = [1, 1]} : vector<24x64xf32> to vector<24x32xf32>
    %194 = arith.addf %3, %193 : vector<24x32xf32>
    %195 = vector.extract_strided_slice %1 {offsets = [12, 0], sizes = [1, 32], strides = [1, 1]} : vector<16x128xf32> to vector<1x32xf32>
    %196 = vector.extract_strided_slice %1 {offsets = [13, 0], sizes = [1, 32], strides = [1, 1]} : vector<16x128xf32> to vector<1x32xf32>
    %cst_40 = arith.constant dense<0.000000e+00> : vector<24xf32>
    %197 = vector.multi_reduction <add>, %194, %cst_40 [1] : vector<24x32xf32> to vector<24xf32>
    %198 = vector.shape_cast %197 : vector<24xf32> to vector<24x1xf32>
    %cst_41 = arith.constant 3.200000e+01 : f32
    %199 = vector.broadcast %cst_41 : f32 to vector<24x1xf32>
    %200 = arith.divf %198, %199 : vector<24x1xf32>
    %201 = vector.broadcast %200 : vector<24x1xf32> to vector<24x32xf32>
    %202 = arith.subf %194, %201 : vector<24x32xf32>
    %203 = arith.mulf %202, %202 : vector<24x32xf32>
    %cst_42 = arith.constant dense<0.000000e+00> : vector<24xf32>
    %204 = vector.multi_reduction <add>, %203, %cst_42 [1] : vector<24x32xf32> to vector<24xf32>
    %205 = vector.shape_cast %204 : vector<24xf32> to vector<24x1xf32>
    %cst_43 = arith.constant 3.200000e+01 : f32
    %206 = vector.broadcast %cst_43 : f32 to vector<24x1xf32>
    %207 = arith.divf %205, %206 : vector<24x1xf32>
    %208 = vector.broadcast %200 : vector<24x1xf32> to vector<24x32xf32>
    %209 = arith.subf %194, %208 : vector<24x32xf32>
    %cst_44 = arith.constant 9.99999974E-6 : f32
    %210 = vector.broadcast %cst_44 : f32 to vector<24x1xf32>
    %211 = arith.addf %207, %210 : vector<24x1xf32>
    %212 = math.rsqrt %211 : vector<24x1xf32>
    %213 = vector.broadcast %212 : vector<24x1xf32> to vector<24x32xf32>
    %214 = arith.mulf %209, %213 : vector<24x32xf32>
    %215 = vector.broadcast %195 : vector<1x32xf32> to vector<24x32xf32>
    %216 = arith.mulf %214, %215 : vector<24x32xf32>
    %217 = vector.broadcast %196 : vector<1x32xf32> to vector<24x32xf32>
    %218 = arith.addf %216, %217 : vector<24x32xf32>
    %cst_45 = arith.constant 0.000000e+00 : f32
    %219 = vector.broadcast %cst_45 : f32 to vector<24x64xf32>
    %220 = tpu.concatenate %192, %218, %219 in 1 : vector<24x32xf32>, vector<24x32xf32>, vector<24x64xf32> -> vector<24x128xf32>
    %c0_46 = arith.constant 0 : index
    %c0_47 = arith.constant 0 : index
    %221 = vector.load %arg6[%c0_46, %c0_47] : memref<24x128xf32, #tpu.memory_space<vmem>>, vector<24x128xf32>
    tpu.vector_store %arg6[%c0_46, %c0_47], %220 {strides = array<i32>} : memref<24x128xf32, #tpu.memory_space<vmem>>, vector<24x128xf32>,
    return
  }
}

</mosaic_0001>

<bundles_post_ra>
// kernel: forward.1
= control target key start
LH: loop header
LB: loop body
LE: loop exit
PB: predicated region body
PF: predicated region fallthrough
CT: control target
= control target key end

     0   :  { %11 = vsyncpa [#allocation3], 0  ;;  %s5309_s0 = inlined_call_operand.vmem [shape: f32[24,96], index: 0, kind: input, shape index: {}]   ;;  %s5310_s1 = inlined_call_operand.vmem [shape: f32[1,24], index: 1, kind: input, shape index: {}]   ;;  %s5311_s2 = inlined_call_operand.vmem [shape: f32[64,320], index: 2, kind: input, shape index: {}]   ;;  %s5312_s3 = inlined_call_operand.vmem [shape: f32[32,192], index: 3, kind: input, shape index: {}]   ;;  %s5313_s4 = inlined_call_operand.vmem [shape: f32[128,96], index: 4, kind: input, shape index: {}]   ;;  %s5314_s5 = inlined_call_operand.hbm [shape: f32[16,128], index: 5, kind: input, shape index: {}]   ;;  %s5315_s6 = inlined_call_operand.hbm [shape: f32[24,128], index: 6, kind: output, shape index: {}]  }
   0x1   :  { %12 = vsyncpa [#allocation4], 0  ;;  %s4071_s21 = smov [#allocation2]   ;;  %s4023_s25 = scalar_lea.hbm %s5314_s5, 256 }
   0x2   :  { %s28_s22 = sshll.u32 %s4071_s21, 4  ;;  %p4024_p0 = scmp.ne.s32.totalorder %s5314_s5, %s4023_s25  ;;  %s29_s22 = int_to_ptr.vmem [resolvable:$true] %s28_s22 }
   0x3   :  { %p4027_p1 = scmp.lt.u32.totalorder %s4023_s25, %s5314_s5 }
   0x5   :  { %p4029_p2 = pnand %p4027_p1, %p4024_p0 }
   0x7   :  { %4032 = shalt.err (!%p4029_p2)
}
   0x8   :  { %s4033_s30 = scalar_lea.vmem %s29_s22, 256  ;;  %p4038_p4 = scmp.lt.s32.totalorder %s29_s22, %s29_s22 }
   0x9   :  { %p4034_p3 = scmp.ne.s32.totalorder %s29_s22, %s4033_s30  ;;  %p4039_p5 = scmp.lt.s32.totalorder %s4033_s30, %s4033_s30 }
   0xb   :  { %p4040_p6 = por %p4039_p5, %p4038_p4 }
   0xd   :  { %p4041_p7 = pnand %p4040_p6, %p4034_p3 }
   0xf   :  { %4044 = shalt.err (!%p4041_p7)
}
  0x10   :  { %s4072_s7 = smov 128   ;;  %s4073_s8 = smov 8  }
  0x11   :  { %34 = dma.hbm_to_vmem [thread:$0]  %s5314_s5, 256, %s29_s22, [#allocation3], %s4072_s7, %s4072_s7, %s4073_s8  }
  0x12   :  { %4067 = dma.done.wait [#allocation3], 256  }
  0x13   :  { %4068 = vsyncadd [#allocation3], 4294967040  ;;  %v4074_v0 = vmov 0.0|0.0   ;;  %v4075_v1 = vmov 0.0   ;;  %vm4076_vm0 = vmmov 0   ;;  %v4145_v2 = vld [vmem:[%s5309_s0] sm:$0xff]  ;;  %v271_v53 = vlaneseq }
  0x14   :  { %3676 = vmatprep.subr.bf16.mxu1 %v4074_v0  ;;  %172 = vmatprep.mubr.f32.mxu0 %v4075_v1  ;;  %v4150_v3 = vld [vmem:[%s5309_s0 + $0x8] sm:$0xff]  ;;  %s4077_s5 = smov 64   ;;  %v78_v5 = vld [vmem:[%s5311_s2 + $0x20] sm:$0xff]  ;;  %v77_v8 = vld [vmem:[%s5311_s2 + $0x18] sm:$0xff]  ;;  %s4078_s15 = smov 96   ;;  %vm70_vm1 = vcmask 261120  }
  0x15   :  { %3311 = vmatprep.mubr.msk.f32.mxu1 %vm4076_vm0, %v4075_v1  ;;  %49 = vrot.lane.b32.xlu0 %v4145_v2, %s4077_s5  ;;  %v75_v4 = vld [vmem:[%s5311_s2 + $0x8] sm:$0xff]  ;;  %v74_v7 = vld [vmem:[%s5311_s2] sm:$0xff]  ;;  %v76_v9 = vld [vmem:[%s5311_s2 + $0x10] sm:$0xff]  ;;  %vm98_vm2 = vcmask 523264   ;;  %v4263_v54 = vshrl.u32 %v271_v53, 7  ;;  %s4080_s23 = smov 120  }
  0x16   :  { %51 = vrot.lane.b32.xlu1 %v4150_v3, %s4077_s5  ;;  %v3660_v6 = vpack.c.bf16 %v78_v5, %v75_v4  ;;  %v3662_v10 = vpack.c.bf16 %v77_v8, %v74_v7  ;;  %v79_v11 = vld [vmem:[%s5311_s2 + $0x28] sm:$0xff]  ;;  %v81_v12 = vld [vmem:[%s5311_s2 + $0x38] sm:$0xff]  ;;  %v84_v13 = vld [vmem:[%s5311_s2 + $0x50] sm:$0xff]  ;;  %s4081_s24 = smov 116   ;;  %s4082_s25 = smov 112   ;;  %vm389_vm3 = vcmask 31744  }
  0x17   :  { %v3677_v14 = vpack.c.bf16 %v79_v11, %v76_v9  ;;  %v3664_v15 = vpack.c.bf16 %v84_v13, %v81_v12  ;;  %v80_v16 = vld [vmem:[%s5311_s2 + $0x30] sm:$0xff]  ;;  %v83_v17 = vld [vmem:[%s5311_s2 + $0x48] sm:$0xff]  ;;  %v82_v18 = vld [vmem:[%s5311_s2 + $0x40] sm:$0xff]  ;;  %v4266_v55 = vsub.s32 0, %v4263_v54  ;;  %s4083_s26 = smov 108   ;;  %s4084_s27 = smov 104  }
  0x18   :  { %3661 = vmatprep.subr.bf16.mxu0 %v3660_v6  ;;  %v85_v19 = vld [vmem:[%s5311_s2 + $0x58] sm:$0xff]  ;;  %v87_v20 = vld [vmem:[%s5311_s2 + $0x68] sm:$0xff]  ;;  %v40_v21 = vld [vmem:[%s5309_s0 + $0x10] sm:$0xff]  ;;  %v3666_v22 = vpack.c.bf16 %v83_v17, %v80_v16  ;;  %s4085_s28 = smov 100   ;;  %s4086_s29 = smov 32   ;;  %vm1222_vm5 = vcmask 195584  }
  0x19   :  { %61 = vrot.lane.b32.xlu0 %v4145_v2, %s4078_s15  ;;  %3663 = vmatpush1.bf16.msra.mxu0 %v3662_v10  ;;  %v3680_v23 = vpack.c.bf16 %v85_v19, %v82_v18  ;;  %v90_v24 = vld [vmem:[%s5311_s2 + $0x80] sm:$0xff]  ;;  %v89_v27 = vld [vmem:[%s5311_s2 + $0x78] sm:$0xff]  ;;  %v88_v28 = vld [vmem:[%s5311_s2 + $0x70] sm:$0xff] }
  0x1a   :  { %63 = vrot.lane.b32.xlu1 %v4150_v3, %s4078_s15  ;;  %3678 = vmatpush3.bf16.msra.mxu1 %v3677_v14  ;;  %v86_v25 = vld [vmem:[%s5311_s2 + $0x60] sm:$0xff]  ;;  %v3668_v26 = vpack.c.bf16 %v90_v24, %v87_v20  ;;  %v91_v29 = vld [vmem:[%s5311_s2 + $0x88] sm:$0xff]  ;;  %v93_v30 = vld [vmem:[%s5311_s2 + $0x98] sm:$0xff] }
  0x1b   :  { %3665 = vmatprep.subr.bf16.mxu0 %v3664_v15  ;;  %3679 = vmatprep.subr.bf16.mxu1 %v4074_v0  ;;  %v96_v31 = vld [vmem:[%s5311_s2 + $0xb0] sm:$0xff]  ;;  %v3670_v32 = vpack.c.bf16 %v89_v27, %v86_v25  ;;  %v3683_v33 = vpack.c.bf16 %v91_v29, %v88_v28  ;;  %v95_v36 = vld [vmem:[%s5311_s2 + $0xa8] sm:$0xff]  ;;  %v94_v37 = vld [vmem:[%s5311_s2 + $0xa0] sm:$0xff] }
  0x1c   :  { %v92_v34 = vld [vmem:[%s5311_s2 + $0x90] sm:$0xff]  ;;  %v3672_v35 = vpack.c.bf16 %v96_v31, %v93_v30  ;;  %v97_v38 = vld [vmem:[%s5311_s2 + $0xb8] sm:$0xff]  ;;  %v41_v56 = vld [vmem:[#allocation2] sm:$0xff]  ;;  %s4079_s2 = smov 124  }
  0x1d   :  { %53 = vrot.lane.b32.xlu0 %v40_v21, %s4077_s5  ;;  %3667 = vmatpush1.bf16.msra.mxu0 %v3666_v22  ;;  %v3674_v39 = vpack.c.bf16 %v95_v36, %v92_v34  ;;  %v3686_v40 = vpack.c.bf16 %v97_v38, %v94_v37  ;;  %v274_v57 = vrot.slane %v41_v56, %v4266_v55  ;;  %vm4400_vm4 = vmpackc.low %vm389_vm3, %vm389_vm3 }
  0x1e   :  { %65 = vrot.lane.b32.xlu1 %v40_v21, %s4078_s15  ;;  %3681 = vmatpush3.bf16.msra.mxu1 %v3680_v23 }
  0x1f   :  { %3669 = vmatprep.subr.bf16.mxu0 %v3668_v26  ;;  %3682 = vmatprep.subr.bf16.mxu1 %v4074_v0 }
  0x21   :  { %3671 = vmatpush1.bf16.msra.mxu0 %v3670_v32 }
  0x22   :  { %3684 = vmatpush3.bf16.msra.mxu1 %v3683_v33  ;;  %3673 = vmatprep.subr.bf16.mxu0 %v3672_v35 }
  0x23   :  { %3685 = vmatprep.subr.bf16.mxu1 %v4074_v0 }
  0x25   :  { %3675 = vmatpush1.bf16.msra.mxu0 %v3674_v39 }
  0x26   :  { %3687 = vmatpush3.bf16.msra.mxu1 %v3686_v40  ;;  %3688 = vmatprep.subr.bf16.mxu0 %v4074_v0 }
  0x27   :  { %3700 = vmatprep.subr.bf16.mxu1 %v4074_v0 }
  0x87   :  { %v50_v41 = vpop.permute.xlu0 %49 }
  0x88   :  { %v52_v42 = vpop.permute.xlu1 %51  ;;  %v58_v43 = vadd.f32 %v50_v41, %v4145_v2 }
  0x89   :  { %v59_v46 = vadd.f32 %v52_v42, %v4150_v3 }
  0x8b   :  { %v62_v44 = vpop.permute.xlu0 %61 }
  0x8c   :  { %v64_v45 = vpop.permute.xlu1 %63  ;;  %v71_v47 = vsel %vm70_vm1, %v58_v43, %v62_v44 }
  0x8d   :  { %3057 = vmatmul.mubr.msk.f32.vlgmr.msra.gmra.mrb[0].mxu0 %vm98_vm2, %v71_v47  ;;  %3312 = vmatmul.mubr.msk.f32.vlgmr.msra.gmra.mrb[0].mxu1 %vm98_vm2, %v71_v47  ;;  %v72_v50 = vsel %vm70_vm1, %v59_v46, %v64_v45 }
  0x8e   :  { %178 = vmatprep.mubr.f32.mxu0 %v4075_v1  ;;  %3314 = vmatprep.mubr.msk.f32.mxu1 %vm4076_vm0, %v4075_v1 }
  0x8f   :  { %v54_v48 = vpop.permute.xlu0 %53 }
  0x90   :  { %v66_v49 = vpop.permute.xlu1 %65  ;;  %v60_v51 = vadd.f32 %v54_v48, %v40_v21 }
  0x91   :  { %3058 = vmatmul.mubr.msk.f32.gmra.mrb[2].mxu0 %vm98_vm2, %v72_v50  ;;  %3315 = vmatmul.mubr.msk.f32.gmra.mrb[2].mxu1 %vm98_vm2, %v72_v50 }
  0x92   :  { %v73_v52 = vsel %vm70_vm1, %v60_v51, %v66_v49  ;;  %184 = vmatprep.mubr.f32.mxu0 %v4075_v1  ;;  %3317 = vmatprep.mubr.msk.f32.mxu1 %vm4076_vm0, %v4075_v1 }
  0x95   :  { %3059 = vmatmul.mubr.msk.f32.gmra.mrb[4].mxu0 %vm98_vm2, %v73_v52  ;;  %3318 = vmatmul.mubr.msk.f32.gmra.mrb[4].mxu1 %vm98_vm2, %v73_v52 }
  0x96   :  { %3326 = vmatprep.mubr.msk.f32.mxu0 %vm4076_vm0, %v4075_v1  ;;  %3371 = vmatprep.mubr.msk.f32.mxu1 %vm4076_vm0, %v4075_v1 }
 0x160   :  { %v4269_v58 = vpop.f32.mrb[0].mxu0  ;;  %v257_v59 = vpop.f32.mrb[0].mxu1 }
 0x161   :  { %v4271_v60 = vadd.f32 %v274_v57, %v257_v59  ;;  %v4273_v61 = vpop.f32.mrb[1].mxu0  ;;  %v3313_v62 = vpop.f32.mrb[1].mxu1 }
 0x163   :  { %281 = vrot.lane.b32.xlu0 %v4271_v60, %s4079_s2 }
 0x164   :  { %v4276_v63 = vpop.f32.mrb[2].mxu0  ;;  %v262_v2 = vpop.f32.mrb[2].mxu1 }
 0x165   :  { %v3721_v3 = vpack.c.bf16 %v4276_v63, %v4269_v58  ;;  %v4280_v4 = vadd.f32 %v274_v57, %v262_v2  ;;  %v4282_v5 = vpop.f32.mrb[3].mxu0  ;;  %v3316_v6 = vpop.f32.mrb[3].mxu1  ;;  %v4286_v7 = vpack.i.bf16 %v4276_v63, %v4269_v58  ;;  %v43_v58 = vld [vmem:[%s5310_s1] sm:$0x1] }
 0x166   :  { %v3733_v8 = vpack.c.bf16 %v4282_v5, %v4273_v61  ;;  %v4292_v9 = vpack.i.bf16 %v4282_v5, %v4273_v61  ;;  %v3056_v63 = vadd.f32 -1.0, %v43_v58 }
 0x167   :  { %289 = vrot.lane.b32.xlu0 %v4280_v4, %s4080_s23  ;;  %283 = vrot.lane.b32.xlu1 %v4280_v4, %s4079_s2  ;;  %v3809_v15 = vpack.i.bf16 %v4280_v4, %v4271_v60 }
 0x168   :  { %v4296_v10 = vpop.f32.mrb[4].mxu0  ;;  %v267_v11 = vpop.f32.mrb[4].mxu1 }
 0x169   :  { %v4298_v12 = vadd.f32 %v274_v57, %v267_v11  ;;  %v4300_v13 = vpop.f32.mrb[5].mxu0  ;;  %v3319_v14 = vpop.f32.mrb[5].mxu1 }
 0x16b   :  { %287 = vrot.lane.b32.xlu1 %v4271_v60, %s4080_s23  ;;  %285 = vrot.lane.b32.xlu0 %v4298_v12, %s4079_s2 }
 0x16f   :  { %293 = vrot.lane.b32.xlu1 %v4271_v60, %s4081_s24  ;;  %295 = vrot.lane.b32.xlu0 %v4280_v4, %s4081_s24 }
 0x173   :  { %299 = vrot.lane.b32.xlu1 %v4271_v60, %s4082_s25  ;;  %301 = vrot.lane.b32.xlu0 %v4280_v4, %s4082_s25 }
 0x177   :  { %291 = vrot.lane.b32.xlu1 %v4298_v12, %s4080_s23  ;;  %297 = vrot.lane.b32.xlu0 %v4298_v12, %s4081_s24 }
 0x17b   :  { %305 = vrot.lane.b32.xlu1 %v4271_v60, %s4083_s26  ;;  %307 = vrot.lane.b32.xlu0 %v4280_v4, %s4083_s26 }
 0x17f   :  { %311 = vrot.lane.b32.xlu1 %v4271_v60, %s4084_s27  ;;  %313 = vrot.lane.b32.xlu0 %v4280_v4, %s4084_s27 }
 0x183   :  { %303 = vrot.lane.b32.xlu1 %v4298_v12, %s4082_s25  ;;  %309 = vrot.lane.b32.xlu0 %v4298_v12, %s4083_s26 }
 0x187   :  { %317 = vrot.lane.b32.xlu1 %v4271_v60, %s4085_s28  ;;  %319 = vrot.lane.b32.xlu0 %v4280_v4, %s4085_s28 }
 0x18b   :  { %315 = vrot.lane.b32.xlu1 %v4298_v12, %s4084_s27  ;;  %3810 = vrot.lane.b32.xlu0 %v3809_v15, %s4078_s15 }
 0x18f   :  { %321 = vrot.lane.b32.xlu1 %v4298_v12, %s4085_s28  ;;  %387 = vrot.lane.b32.xlu0 %v4298_v12, %s4078_s15 }
 0x1d5   :  { %v4325_v16 = vpop.permute.xlu0 %281 }
 0x1d9   :  { %v4327_v17 = vpop.permute.xlu1 %283  ;;  %v4329_v18 = vpop.permute.xlu0 %289 }
 0x1da   :  { %v3814_v19 = vpack.i.bf16 %v4327_v17, %v4325_v16 }
 0x1dc   :  { %3815 = vrot.lane.b32.xlu1 %v3814_v19, %s4078_s15 }
 0x1dd   :  { %v4334_v20 = vpop.permute.xlu1 %287  ;;  %v4336_v21 = vpop.permute.xlu0 %285 }
 0x1de   :  { %v3819_v22 = vpack.i.bf16 %v4329_v18, %v4334_v20  ;;  %486 = vrot.lane.b32.xlu0 %v4336_v21, %s4078_s15 }
 0x1e0   :  { %3820 = vrot.lane.b32.xlu1 %v3819_v22, %s4078_s15 }
 0x1e1   :  { %v4343_v23 = vpop.permute.xlu1 %293  ;;  %v4345_v24 = vpop.permute.xlu0 %295 }
 0x1e2   :  { %v3824_v25 = vpack.i.bf16 %v4345_v24, %v4343_v23 }
 0x1e4   :  { %3825 = vrot.lane.b32.xlu0 %v3824_v25, %s4078_s15 }
 0x1e5   :  { %v4350_v26 = vpop.permute.xlu1 %299  ;;  %v4352_v27 = vpop.permute.xlu0 %301 }
 0x1e6   :  { %v3829_v30 = vpack.i.bf16 %v4352_v27, %v4350_v26 }
 0x1e9   :  { %v4354_v28 = vpop.permute.xlu1 %291  ;;  %v4356_v29 = vpop.permute.xlu0 %297 }
 0x1ea   :  { %584 = vrot.lane.b32.xlu1 %v4354_v28, %s4078_s15  ;;  %682 = vrot.lane.b32.xlu0 %v4356_v29, %s4078_s15 }
 0x1ed   :  { %v4364_v31 = vpop.permute.xlu1 %305  ;;  %v4366_v32 = vpop.permute.xlu0 %307 }
 0x1ee   :  { %v3834_v33 = vpack.i.bf16 %v4366_v32, %v4364_v31  ;;  %3830 = vrot.lane.b32.xlu1 %v3829_v30, %s4078_s15 }
 0x1f0   :  { %3835 = vrot.lane.b32.xlu0 %v3834_v33, %s4078_s15 }
 0x1f1   :  { %v4372_v34 = vpop.permute.xlu1 %311  ;;  %v4374_v35 = vpop.permute.xlu0 %313 }
 0x1f2   :  { %v3839_v38 = vpack.i.bf16 %v4374_v35, %v4372_v34 }
 0x1f5   :  { %v4376_v36 = vpop.permute.xlu1 %303  ;;  %v4378_v37 = vpop.permute.xlu0 %309 }
 0x1f6   :  { %780 = vrot.lane.b32.xlu1 %v4376_v36, %s4078_s15  ;;  %878 = vrot.lane.b32.xlu0 %v4378_v37, %s4078_s15 }
 0x1f9   :  { %v4386_v39 = vpop.permute.xlu1 %317  ;;  %v4388_v40 = vpop.permute.xlu0 %319 }
 0x1fa   :  { %v3844_v41 = vpack.i.bf16 %v4388_v40, %v4386_v39  ;;  %3840 = vrot.lane.b32.xlu1 %v3839_v38, %s4078_s15 }
 0x1fc   :  { %3845 = vrot.lane.b32.xlu0 %v3844_v41, %s4078_s15 }
 0x1fd   :  { %v4394_v42 = vpop.permute.xlu1 %315  ;;  %v3811_v43 = vpop.permute.xlu0 %3810 }
 0x1fe   :  { %v3813_v44 = vunpack.i.h.bf16 %v3811_v43  ;;  %v3812_v45 = vunpack.i.l.bf16 %v3811_v43  ;;  %976 = vrot.lane.b32.xlu1 %v4394_v42, %s4078_s15 }
 0x200   :  { %v3689_v46 = vpack.c.bf16 %v3813_v44, %v3812_v45 }
 0x201   :  { %v4404_v48 = vpop.permute.xlu1 %321  ;;  %v388_v49 = vpop.permute.xlu0 %387 }
 0x202   :  { %3850 = vrot.lane.b32.xlu1 %v4286_v7, %s4078_s15  ;;  %1074 = vrot.lane.b32.xlu0 %v4404_v48, %s4078_s15 }
 0x203   :  { %3691 = vmatpush3.bf16.xpose.msk.msra.mxu0 %vm4400_vm4, %v3689_v46 }
 0x204   :  { %3324 = vmatprep.subr.mxu0 %v4075_v1 }
 0x206   :  { %3855 = vrot.lane.b32.xlu1 %v4286_v7, %s4077_s5  ;;  %330 = vrot.lane.b32.xlu0 %v4296_v10, %s4078_s15 }
 0x20a   :  { %3860 = vrot.lane.b32.xlu1 %v4286_v7, %s4086_s29  ;;  %339 = vrot.lane.b32.xlu0 %v4296_v10, %s4077_s5 }
 0x20b   :  { %3325 = vmatpush3.xpose.msk.msra.mxu0 %vm389_vm3, %v388_v49 }
 0x20c   :  { %3692 = vmatprep.subr.bf16.mxu0 %v4074_v0 }
 0x20e   :  { %3327 = vmatmul.mubr.msk.f32.vlgmr.msra.gmra.mrb[6].mxu0 %vm389_vm3, %v4271_v60  ;;  %348 = vrot.lane.b32.xlu1 %v4296_v10, %s4086_s29 }
 0x20f   :  { %3329 = vmatprep.mubr.msk.f32.mxu0 %vm4076_vm0, %v4075_v1 }
 0x212   :  { %3330 = vmatmul.mubr.msk.f32.gmra.mrb[8].mxu0 %vm389_vm3, %v4280_v4 }
 0x213   :  { %3332 = vmatprep.mubr.msk.f32.mxu0 %vm4076_vm0, %v4075_v1 }
 0x216   :  { %3333 = vmatmul.mubr.msk.f32.gmra.mrb[10].mxu0 %vm389_vm3, %v4298_v12 }
 0x217   :  { %3341 = vmatprep.mubr.msk.f32.mxu0 %vm4076_vm0, %v4075_v1 }
 0x24e   :  { %v3816_v50 = vpop.permute.xlu1 %3815 }
 0x24f   :  { %v3818_v51 = vunpack.i.h.bf16 %v3816_v50  ;;  %v3817_v52 = vunpack.i.l.bf16 %v3816_v50 }
 0x250   :  { %v487_v56 = vpop.permute.xlu0 %486 }
 0x251   :  { %v3693_v53 = vpack.c.bf16 %v3818_v51, %v3817_v52 }
 0x252   :  { %v3821_v57 = vpop.permute.xlu1 %3820 }
 0x253   :  { %3695 = vmatpush3.bf16.xpose.msk.msra.mxu0 %vm4400_vm4, %v3693_v53  ;;  %v3823_v2 = vunpack.i.h.bf16 %v3821_v57  ;;  %v3822_v4 = vunpack.i.l.bf16 %v3821_v57 }
 0x254   :  { %3339 = vmatprep.subr.mxu0 %v4075_v1 }
 0x255   :  { %v3697_v11 = vpack.c.bf16 %v3823_v2, %v3822_v4 }
 0x256   :  { %v3826_v59 = vpop.permute.xlu0 %3825 }
 0x257   :  { %v3828_v60 = vunpack.i.h.bf16 %v3826_v59  ;;  %v3827_v62 = vunpack.i.l.bf16 %v3826_v59 }
 0x259   :  { %v3701_v6 = vpack.c.bf16 %v3828_v60, %v3827_v62 }
 0x25b   :  { %3340 = vmatpush3.xpose.msk.msra.mxu0 %vm389_vm3, %v487_v56  ;;  %3703 = vmatpush3.bf16.xpose.msk.msra.mxu1 %vm4400_vm4, %v3701_v6 }
 0x25c   :  { %v585_v7 = vpop.permute.xlu1 %584  ;;  %3696 = vmatprep.subr.bf16.mxu0 %v4074_v0  ;;  %3369 = vmatprep.subr.mxu1 %v4075_v1  ;;  %v683_v12 = vpop.permute.xlu0 %682 }
 0x25e   :  { %3342 = vmatmul.mubr.msk.f32.vlgmr.msra.gmra.mrb[12].mxu0 %vm389_vm3, %v4325_v16 }
 0x25f   :  { %3699 = vmatpush3.bf16.xpose.msk.msra.mxu0 %vm4400_vm4, %v3697_v11  ;;  %3344 = vmatprep.mubr.msk.f32.mxu0 %vm4076_vm0, %v4075_v1 }
 0x260   :  { %3354 = vmatprep.subr.mxu0 %v4075_v1  ;;  %v3831_v14 = vpop.permute.xlu1 %3830 }
 0x261   :  { %v3833_v16 = vunpack.i.h.bf16 %v3831_v14  ;;  %v3832_v25 = vunpack.i.l.bf16 %v3831_v14 }
 0x262   :  { %v3836_v15 = vpop.permute.xlu0 %3835  ;;  %3345 = vmatmul.mubr.msk.f32.gmra.mrb[14].mxu0 %vm389_vm3, %v4327_v17 }
 0x263   :  { %v3838_v19 = vunpack.i.h.bf16 %v3836_v15  ;;  %v3837_v22 = vunpack.i.l.bf16 %v3836_v15  ;;  %3370 = vmatpush3.xpose.msk.msra.mxu1 %vm389_vm3, %v683_v12  ;;  %3347 = vmatprep.mubr.msk.f32.mxu0 %vm4076_vm0, %v4075_v1  ;;  %v3705_v33 = vpack.c.bf16 %v3833_v16, %v3832_v25 }
 0x264   :  { %3708 = vmatprep.subr.bf16.mxu1 %v4074_v0 }
 0x265   :  { %v3709_v30 = vpack.c.bf16 %v3838_v19, %v3837_v22 }
 0x266   :  { %3348 = vmatmul.mubr.msk.f32.gmra.mrb[16].mxu0 %vm389_vm3, %v4336_v21  ;;  %3372 = vmatmul.mubr.msk.f32.vlgmr.msra.gmra.mrb[6].mxu1 %vm389_vm3, %v4343_v23 }
 0x267   :  { %3355 = vmatpush3.xpose.msk.msra.mxu0 %vm389_vm3, %v585_v7  ;;  %3711 = vmatpush3.bf16.xpose.msk.msra.mxu1 %vm4400_vm4, %v3709_v30 }
 0x268   :  { %v781_v17 = vpop.permute.xlu1 %780  ;;  %3356 = vmatprep.mubr.msk.f32.mxu0 %vm4076_vm0, %v4075_v1  ;;  %3374 = vmatprep.mubr.msk.f32.mxu1 %vm4076_vm0, %v4075_v1  ;;  %v879_v21 = vpop.permute.xlu0 %878 }
 0x269   :  { %3704 = vmatprep.subr.bf16.mxu0 %v4074_v0  ;;  %3399 = vmatprep.subr.mxu1 %v4075_v1 }
 0x26a   :  { %3357 = vmatmul.mubr.msk.f32.vlgmr.msra.gmra.mrb[18].mxu0 %vm389_vm3, %v4334_v20  ;;  %3375 = vmatmul.mubr.msk.f32.gmra.mrb[8].mxu1 %vm389_vm3, %v4345_v24 }
 0x26b   :  { %3707 = vmatpush3.bf16.xpose.msk.msra.mxu0 %vm4400_vm4, %v3705_v33  ;;  %3359 = vmatprep.mubr.msk.f32.mxu0 %vm4076_vm0, %v4075_v1 }
 0x26c   :  { %v3841_v23 = vpop.permute.xlu1 %3840  ;;  %3377 = vmatprep.mubr.msk.f32.mxu1 %vm4076_vm0, %v4075_v1  ;;  %3384 = vmatprep.subr.mxu0 %v4075_v1 }
 0x26d   :  { %v3843_v43 = vunpack.i.h.bf16 %v3841_v23  ;;  %v3842_v44 = vunpack.i.l.bf16 %v3841_v23 }
 0x26e   :  { %v3846_v38 = vpop.permute.xlu0 %3845  ;;  %3360 = vmatmul.mubr.msk.f32.gmra.mrb[20].mxu0 %vm389_vm3, %v4329_v18  ;;  %3378 = vmatmul.mubr.msk.f32.gmra.mrb[10].mxu1 %vm389_vm3, %v4356_v29 }
 0x26f   :  { %v3848_v20 = vunpack.i.h.bf16 %v3846_v38  ;;  %v3847_v24 = vunpack.i.l.bf16 %v3846_v38  ;;  %3400 = vmatpush3.xpose.msk.msra.mxu1 %vm389_vm3, %v879_v21  ;;  %3362 = vmatprep.mubr.msk.f32.mxu0 %vm4076_vm0, %v4075_v1  ;;  %v3713_v18 = vpack.c.bf16 %v3843_v43, %v3842_v44 }
 0x270   :  { %v977_v41 = vpop.permute.xlu1 %976  ;;  %3401 = vmatprep.mubr.msk.f32.mxu1 %vm4076_vm0, %v4075_v1  ;;  %3716 = vmatprep.subr.bf16.mxu1 %v4074_v0 }
 0x271   :  { %v3717_v45 = vpack.c.bf16 %v3848_v20, %v3847_v24 }
 0x272   :  { %3363 = vmatmul.mubr.msk.f32.gmra.mrb[22].mxu0 %vm389_vm3, %v4354_v28  ;;  %3402 = vmatmul.mubr.msk.f32.vlgmr.msra.gmra.mrb[12].mxu1 %vm389_vm3, %v4364_v31 }
 0x273   :  { %3385 = vmatpush3.xpose.msk.msra.mxu0 %vm389_vm3, %v781_v17  ;;  %3719 = vmatpush3.bf16.xpose.msk.msra.mxu1 %vm4400_vm4, %v3717_v45 }
 0x274   :  { %3386 = vmatprep.mubr.msk.f32.mxu0 %vm4076_vm0, %v4075_v1  ;;  %3404 = vmatprep.mubr.msk.f32.mxu1 %vm4076_vm0, %v4075_v1  ;;  %v3851_v28 = vpop.permute.xlu1 %3850  ;;  %v1075_v46 = vpop.permute.xlu0 %1074 }
 0x275   :  { %3712 = vmatprep.subr.bf16.mxu0 %v4074_v0  ;;  %3429 = vmatprep.subr.mxu1 %v4075_v1  ;;  %v3853_v29 = vunpack.i.h.bf16 %v3851_v28  ;;  %v3852_v31 = vunpack.i.l.bf16 %v3851_v28 }
 0x276   :  { %3387 = vmatmul.mubr.msk.f32.vlgmr.msra.gmra.mrb[24].mxu0 %vm389_vm3, %v4350_v26  ;;  %3405 = vmatmul.mubr.msk.f32.gmra.mrb[14].mxu1 %vm389_vm3, %v4366_v32 }
 0x277   :  { %3715 = vmatpush3.bf16.xpose.msk.msra.mxu0 %vm4400_vm4, %v3713_v18  ;;  %3389 = vmatprep.mubr.msk.f32.mxu0 %vm4076_vm0, %v4075_v1  ;;  %v3724_v26 = vpack.c.bf16 %v3853_v29, %v3852_v31 }
 0x278   :  { %3407 = vmatprep.mubr.msk.f32.mxu1 %vm4076_vm0, %v4075_v1  ;;  %3414 = vmatprep.subr.mxu0 %v4075_v1 }
 0x27a   :  { %3390 = vmatmul.mubr.msk.f32.gmra.mrb[26].mxu0 %vm389_vm3, %v4352_v27  ;;  %3408 = vmatmul.mubr.msk.f32.gmra.mrb[16].mxu1 %vm389_vm3, %v4378_v37  ;;  %v331_v27 = vpop.permute.xlu0 %330 }
 0x27b   :  { %3430 = vmatpush3.xpose.msk.msra.mxu1 %vm389_vm3, %v1075_v46  ;;  %3392 = vmatprep.mubr.msk.f32.mxu0 %vm4076_vm0, %v4075_v1 }
 0x27c   :  { %3431 = vmatprep.mubr.msk.f32.mxu1 %vm4076_vm0, %v4075_v1  ;;  %3723 = vmatprep.subr.bf16.mxu1 %v4074_v0 }
 0x27e   :  { %3393 = vmatmul.mubr.msk.f32.gmra.mrb[28].mxu0 %vm389_vm3, %v4376_v36  ;;  %3432 = vmatmul.mubr.msk.f32.vlgmr.msra.gmra.mrb[18].mxu1 %vm389_vm3, %v4386_v39 }
 0x27f   :  { %3415 = vmatpush3.xpose.msk.msra.mxu0 %vm389_vm3, %v977_v41  ;;  %3725 = vmatpush3.bf16.msra.mxu1 %v3724_v26 }
 0x280   :  { %3416 = vmatprep.mubr.msk.f32.mxu0 %vm4076_vm0, %v4075_v1  ;;  %3434 = vmatprep.mubr.msk.f32.mxu1 %vm4076_vm0, %v4075_v1 }
 0x281   :  { %3720 = vmatprep.subr.bf16.mxu0 %v4074_v0  ;;  %3459 = vmatprep.subr.mxu1 %v4075_v1 }
 0x282   :  { %3417 = vmatmul.mubr.msk.f32.vlgmr.msra.gmra.mrb[30].mxu0 %vm389_vm3, %v4372_v34  ;;  %3435 = vmatmul.mubr.msk.f32.gmra.mrb[20].mxu1 %vm389_vm3, %v4388_v40 }
 0x283   :  { %3722 = vmatpush3.bf16.msra.mxu0 %v3721_v3  ;;  %3460 = vmatpush3.msra.mxu1 %v331_v27  ;;  %v45_v3 = vmul.f32 1e+30, %v3056_v63 }
 0x284   :  { %3419 = vmatprep.mubr.msk.f32.mxu0 %vm4076_vm0, %v4075_v1  ;;  %3437 = vmatprep.mubr.msk.f32.mxu1 %vm4076_vm0, %v4075_v1 }
 0x285   :  { %3444 = vmatprep.subr.mxu0 %v4075_v1  ;;  %3729 = vmatprep.subr.bf16.mxu1 %v4074_v0 }
 0x286   :  { %3420 = vmatmul.mubr.msk.f32.gmra.mrb[32].mxu0 %vm389_vm3, %v4374_v35  ;;  %3438 = vmatmul.mubr.msk.f32.gmra.mrb[22].mxu1 %vm389_vm3, %v4404_v48 }
 0x287   :  { %3445 = vmatpush3.msra.mxu0 %v4296_v10  ;;  %3422 = vmatprep.mubr.msk.f32.mxu0 %vm4076_vm0, %v4075_v1  ;;  %v4568_v10 = vrot.slane %v45_v3, %v4266_v55 }
 0x288   :  { %3726 = vmatprep.subr.bf16.mxu0 %v4074_v0  ;;  %3461 = vmatprep.mubr.msk.f32.mxu1 %vm4076_vm0, %v4075_v1 }
 0x28a   :  { %3423 = vmatmul.mubr.msk.f32.gmra.mrb[34].mxu0 %vm389_vm3, %v4394_v42 }
 0x28b   :  { %3446 = vmatprep.mubr.msk.f32.mxu0 %vm4076_vm0, %v4075_v1 }
 0x2e1   :  { %v468_v32 = vpop.f32.mrb[6].mxu0 }
 0x2e2   :  { %v1168_v34 = vmul.f32 0.5, %v468_v32  ;;  %v3328_v35 = vpop.f32.mrb[7].mxu0 }
 0x2e4   :  { %v4571_v36 = vadd.f32 %v4568_v10, %v1168_v34 }
 0x2e5   :  { %v473_v37 = vpop.f32.mrb[8].mxu0 }
 0x2e6   :  { %v1169_v39 = vmul.f32 0.5, %v473_v37  ;;  %v3331_v40 = vpop.f32.mrb[9].mxu0  ;;  %v1223_v42 = vsel %vm1222_vm5, %v4571_v36, -inf }
 0x2e7   :  { %1224 = vmax.xlane.f32.xlu1 %v1223_v42 }
 0x2e8   :  { %v4576_v47 = vadd.f32 %v4568_v10, %v1169_v39 }
 0x2e9   :  { %v478_v48 = vpop.f32.mrb[10].mxu0 }
 0x2ea   :  { %v1170_v49 = vmul.f32 0.5, %v478_v48  ;;  %v3334_v50 = vpop.f32.mrb[11].mxu0  ;;  %v1226_v51 = vsel %vm1222_vm5, %v4576_v47, -inf }
 0x2eb   :  { %1227 = vmax.xlane.f32.xlu0 %v1226_v51 }
 0x2ec   :  { %v4581_v52 = vadd.f32 %v4568_v10, %v1170_v49 }
 0x2ee   :  { %v1229_v53 = vsel %vm1222_vm5, %v4581_v52, -inf }
 0x2ef   :  { %1230 = vmax.xlane.f32.xlu0 %v1229_v53 }
 0x331   :  { %v566_v56 = vpop.f32.mrb[12].mxu0 }
 0x332   :  { %v1171_v57 = vmul.f32 0.5, %v566_v56  ;;  %v3343_v59 = vpop.f32.mrb[13].mxu0 }
 0x334   :  { %v4586_v60 = vadd.f32 %v4568_v10, %v1171_v57 }
 0x335   :  { %v571_v62 = vpop.f32.mrb[14].mxu0 }
 0x336   :  { %v3346_v2 = vpop.f32.mrb[15].mxu0  ;;  %v1232_v4 = vsel %vm1222_vm5, %v4586_v60, -inf  ;;  %v1172_v11 = vmul.f32 0.5, %v571_v62 }
 0x337   :  { %1233 = vmax.xlane.f32.xlu0 %v1232_v4 }
 0x338   :  { %v4596_v23 = vadd.f32 %v4568_v10, %v1172_v11 }
 0x339   :  { %v576_v6 = vpop.f32.mrb[16].mxu0  ;;  %v762_v7 = vpop.f32.mrb[6].mxu1 }
 0x33a   :  { %v1177_v12 = vmul.f32 0.5, %v762_v7  ;;  %v3349_v14 = vpop.f32.mrb[17].mxu0  ;;  %v3373_v15 = vpop.f32.mrb[7].mxu1  ;;  %v1173_v20 = vmul.f32 0.5, %v576_v6  ;;  %v1235_v18 = vsel %vm1222_vm5, %v4596_v23, -inf }
 0x33c   :  { %v4591_v19 = vadd.f32 %v4568_v10, %v1177_v12  ;;  %v4616_v35 = vadd.f32 %v4568_v10, %v1173_v20 }
 0x33d   :  { %v664_v22 = vpop.f32.mrb[18].mxu0  ;;  %v767_v16 = vpop.f32.mrb[8].mxu1 }
 0x33e   :  { %v1174_v25 = vmul.f32 0.5, %v664_v22  ;;  %v1178_v30 = vmul.f32 0.5, %v767_v16  ;;  %v3358_v17 = vpop.f32.mrb[19].mxu0  ;;  %v3376_v33 = vpop.f32.mrb[9].mxu1  ;;  %v1250_v21 = vsel %vm1222_vm5, %v4591_v19, -inf  ;;  %v1238_v53 = vsel %vm1222_vm5, %v4616_v35, -inf }
 0x33f   :  { %1251 = vmax.xlane.f32.xlu1 %v1250_v21 }
 0x340   :  { %v4599_v38 = vadd.f32 %v4568_v10, %v1174_v25  ;;  %v4606_v29 = vadd.f32 %v4568_v10, %v1178_v30 }
 0x341   :  { %v669_v24 = vpop.f32.mrb[20].mxu0  ;;  %v772_v41 = vpop.f32.mrb[10].mxu1 }
 0x342   :  { %v1175_v43 = vmul.f32 0.5, %v669_v24  ;;  %v3361_v44 = vpop.f32.mrb[21].mxu0  ;;  %v3379_v45 = vpop.f32.mrb[11].mxu1  ;;  %v1241_v28 = vsel %vm1222_vm5, %v4599_v38, -inf  ;;  %v1179_v46 = vmul.f32 0.5, %v772_v41  ;;  %v1253_v32 = vsel %vm1222_vm5, %v4606_v29, -inf }
 0x343   :  { %1236 = vmax.xlane.f32.xlu1 %v1235_v18  ;;  %1242 = vmax.xlane.f32.xlu0 %v1241_v28 }
 0x344   :  { %v4609_v31 = vadd.f32 %v4568_v10, %v1175_v43  ;;  %v4622_v42 = vadd.f32 %v4568_v10, %v1179_v46 }
 0x345   :  { %v674_v26 = vpop.f32.mrb[22].mxu0  ;;  %v958_v27 = vpop.f32.mrb[12].mxu1 }
 0x346   :  { %v1176_v58 = vmul.f32 0.5, %v674_v26  ;;  %v3364_v63 = vpop.f32.mrb[23].mxu0  ;;  %v3403_v3 = vpop.f32.mrb[13].mxu1  ;;  %v1244_v34 = vsel %vm1222_vm5, %v4609_v31, -inf  ;;  %v1183_v48 = vmul.f32 0.5, %v958_v27  ;;  %v1256_v2 = vsel %vm1222_vm5, %v4622_v42, -inf }
 0x347   :  { %1254 = vmax.xlane.f32.xlu1 %v1253_v32  ;;  %1245 = vmax.xlane.f32.xlu0 %v1244_v34 }
 0x348   :  { %v4619_v37 = vadd.f32 %v4568_v10, %v1176_v58  ;;  %v4636_v14 = vadd.f32 %v4568_v10, %v1183_v48 }
 0x349   :  { %v860_v39 = vpop.f32.mrb[24].mxu0  ;;  %v963_v40 = vpop.f32.mrb[14].mxu1 }
 0x34a   :  { %v1180_v49 = vmul.f32 0.5, %v860_v39  ;;  %v3388_v50 = vpop.f32.mrb[25].mxu0  ;;  %v3406_v51 = vpop.f32.mrb[15].mxu1  ;;  %v1247_v56 = vsel %vm1222_vm5, %v4619_v37, -inf  ;;  %v1184_v4 = vmul.f32 0.5, %v963_v40  ;;  %v1268_v21 = vsel %vm1222_vm5, %v4636_v14, -inf }
 0x34b   :  { %1239 = vmax.xlane.f32.xlu1 %v1238_v53  ;;  %1248 = vmax.xlane.f32.xlu0 %v1247_v56 }
 0x34c   :  { %v4629_v57 = vadd.f32 %v4568_v10, %v1180_v49  ;;  %v4646_v24 = vadd.f32 %v4568_v10, %v1184_v4 }
 0x34d   :  { %v865_v59 = vpop.f32.mrb[26].mxu0  ;;  %v968_v62 = vpop.f32.mrb[16].mxu1 }
 0x34e   :  { %v1181_v6 = vmul.f32 0.5, %v865_v59  ;;  %v3391_v7 = vpop.f32.mrb[27].mxu0  ;;  %v3409_v11 = vpop.f32.mrb[17].mxu1  ;;  %v1259_v12 = vsel %vm1222_vm5, %v4629_v57, -inf  ;;  %v1185_v22 = vmul.f32 0.5, %v968_v62  ;;  %v1271_v27 = vsel %vm1222_vm5, %v4646_v24, -inf }
 0x34f   :  { %1257 = vmax.xlane.f32.xlu1 %v1256_v2  ;;  %1260 = vmax.xlane.f32.xlu0 %v1259_v12  ;;  %v4683_v12 = vpop.permute.xlu1 %3855 }
 0x350   :  { %v4639_v15 = vadd.f32 %v4568_v10, %v1181_v6  ;;  %v4652_v45 = vadd.f32 %v4568_v10, %v1185_v22 }
 0x351   :  { %v870_v16 = vpop.f32.mrb[28].mxu0  ;;  %v1154_v25 = vpop.f32.mrb[18].mxu1 }
 0x352   :  { %v1182_v30 = vmul.f32 0.5, %v870_v16  ;;  %v3394_v17 = vpop.f32.mrb[29].mxu0  ;;  %v3433_v33 = vpop.f32.mrb[19].mxu1  ;;  %v1262_v20 = vsel %vm1222_vm5, %v4639_v15, -inf  ;;  %v1189_v18 = vmul.f32 0.5, %v1154_v25  ;;  %v1274_v34 = vsel %vm1222_vm5, %v4652_v45, -inf }
 0x353   :  { %1269 = vmax.xlane.f32.xlu1 %v1268_v21  ;;  %1263 = vmax.xlane.f32.xlu0 %v1262_v20  ;;  %v4687_v16 = vpop.permute.xlu1 %3860 }
 0x354   :  { %v4649_v41 = vadd.f32 %v4568_v10, %v1182_v30  ;;  %v4666_v51 = vadd.f32 %v4568_v10, %v1189_v18  ;;  %v4705_v18 = vpop.permute.xlu0 %339 }
 0x355   :  { %v1056_v43 = vpop.f32.mrb[30].mxu0  ;;  %v1159_v44 = vpop.f32.mrb[20].mxu1 }
 0x356   :  { %v1186_v28 = vmul.f32 0.5, %v1056_v43  ;;  %v3418_v46 = vpop.f32.mrb[31].mxu0  ;;  %v3436_v26 = vpop.f32.mrb[21].mxu1  ;;  %v1265_v58 = vsel %vm1222_vm5, %v4649_v41, -inf  ;;  %v1190_v39 = vmul.f32 0.5, %v1159_v44  ;;  %v1286_v2 = vsel %vm1222_vm5, %v4666_v51, -inf }
 0x357   :  { %1272 = vmax.xlane.f32.xlu1 %v1271_v27  ;;  %1266 = vmax.xlane.f32.xlu0 %v1265_v58  ;;  %v4689_v25 = vpop.permute.xlu1 %348 }
 0x358   :  { %v4659_v63 = vadd.f32 %v4568_v10, %v1186_v28  ;;  %v4676_v6 = vadd.f32 %v4568_v10, %v1190_v39 }
 0x359   :  { %v1061_v3 = vpop.f32.mrb[32].mxu0  ;;  %v1164_v32 = vpop.f32.mrb[22].mxu1 }
 0x35a   :  { %v1187_v40 = vmul.f32 0.5, %v1061_v3  ;;  %v3421_v48 = vpop.f32.mrb[33].mxu0  ;;  %v3439_v49 = vpop.f32.mrb[23].mxu1  ;;  %v1277_v50 = vsel %vm1222_vm5, %v4659_v63, -inf  ;;  %v1191_v59 = vmul.f32 0.5, %v1164_v32  ;;  %v1289_v7 = vsel %vm1222_vm5, %v4676_v6, -inf }
 0x35b   :  { %1275 = vmax.xlane.f32.xlu1 %v1274_v34  ;;  %1278 = vmax.xlane.f32.xlu0 %v1277_v50 }
 0x35c   :  { %v4669_v53 = vadd.f32 %v4568_v10, %v1187_v40  ;;  %v4681_v11 = vadd.f32 %v4568_v10, %v1191_v59 }
 0x35d   :  { %v1066_v56 = vpop.f32.mrb[34].mxu0 }
 0x35e   :  { %v3424_v62 = vpop.f32.mrb[35].mxu0  ;;  %v1280_v4 = vsel %vm1222_vm5, %v4669_v53, -inf  ;;  %v1292_v22 = vsel %vm1222_vm5, %v4681_v11, -inf  ;;  %v1188_v21 = vmul.f32 0.5, %v1066_v56 }
 0x35f   :  { %1287 = vmax.xlane.f32.xlu1 %v1286_v2  ;;  %1281 = vmax.xlane.f32.xlu0 %v1280_v4 }
 0x360   :  { %v4701_v44 = vadd.f32 %v4568_v10, %v1188_v21 }
 0x363   :  { %1290 = vmax.xlane.f32.xlu1 %v1289_v7 }
 0x367   :  { %1293 = vmax.xlane.f32.xlu1 %v1292_v22 }
 0x374   :  { %v1225_v30 = vpop.xlane.xlu1 %1224 }
 0x375   :  { %v1295_v17 = vsub.f32 %v4571_v36, %v1225_v30  ;;  %v1283_v36 = vsel %vm1222_vm5, %v4701_v44, -inf }
 0x377   :  { %v1319_v33 = vmul.f32 1.442695, %v1295_v17 }
 0x378   :  { %360 = vrot.lane.b32.xlu1 %v4300_v13, %s4078_s15  ;;  %v1228_v28 = vpop.xlane.xlu0 %1227 }
 0x379   :  { %3899 = vpow2.f32 %v1319_v33  ;;  %v1296_v46 = vsub.f32 %v4576_v47, %v1228_v28 }
 0x37b   :  { %v1321_v27 = vmul.f32 1.442695, %v1296_v46 }
 0x37c   :  { %3870 = vrot.lane.b32.xlu1 %v4292_v9, %s4077_s5  ;;  %v1231_v26 = vpop.xlane.xlu0 %1230 }
 0x37d   :  { %v1297_v58 = vsub.f32 %v4581_v52, %v1231_v26  ;;  %3901 = vpow2.f32 %v1321_v27 }
 0x37f   :  { %v1323_v10 = vmul.f32 1.442695, %v1297_v58 }
 0x381   :  { %3903 = vpow2.f32 %v1323_v10 }
 0x383   :  { %v4696_v20 = vpop.eup %3899 }
 0x384   :  { %v1367_v43 = vsel %vm1222_vm5, %v4696_v20, 0.0 }
 0x385   :  { %1368 = vadd.xlane.f32.xlu0 %v1367_v43 }
 0x387   :  { %v4711_v3 = vpop.eup %3901 }
 0x388   :  { %v1370_v32 = vsel %vm1222_vm5, %v4711_v3, 0.0 }
 0x389   :  { %1284 = vmax.xlane.f32.xlu0 %v1283_v36 }
 0x38b   :  { %v4715_v34 = vpop.eup %3903 }
 0x38c   :  { %v1373_v39 = vsel %vm1222_vm5, %v4715_v34, 0.0 }
 0x39f   :  { %3865 = vrot.lane.b32.xlu0 %v4292_v9, %s4078_s15 }
 0x3be   :  { %1371 = vadd.xlane.f32.xlu0 %v1370_v32 }
 0x3c2   :  { %1374 = vadd.xlane.f32.xlu0 %v1373_v39 }
 0x3c4   :  { %v1234_v47 = vpop.xlane.xlu0 %1233 }
 0x3c5   :  { %v1298_v40 = vsub.f32 %v4586_v60, %v1234_v47 }
 0x3c7   :  { %v1325_v48 = vmul.f32 1.442695, %v1298_v40 }
 0x3c9   :  { %3905 = vpow2.f32 %v1325_v48 }
 0x3cc   :  { %v1252_v52 = vpop.xlane.xlu1 %1251 }
 0x3cd   :  { %v1304_v49 = vsub.f32 %v4591_v19, %v1252_v52 }
 0x3cf   :  { %v1337_v50 = vmul.f32 1.442695, %v1304_v49 }
 0x3d0   :  { %v1237_v56 = vpop.xlane.xlu1 %1236  ;;  %v1243_v30 = vpop.xlane.xlu0 %1242 }
 0x3d1   :  { %3907 = vpow2.f32 %v1337_v50  ;;  %v1299_v59 = vsub.f32 %v4596_v23, %v1237_v56  ;;  %v1301_v23 = vsub.f32 %v4599_v38, %v1243_v30 }
 0x3d3   :  { %v4722_v62 = vpop.eup %3905  ;;  %v1327_v2 = vmul.f32 1.442695, %v1299_v59  ;;  %v1331_v46 = vmul.f32 1.442695, %v1301_v23 }
 0x3d4   :  { %v1255_v4 = vpop.xlane.xlu1 %1254  ;;  %v1376_v7 = vsel %vm1222_vm5, %v4722_v62, 0.0  ;;  %v1246_v27 = vpop.xlane.xlu0 %1245 }
 0x3d5   :  { %3909 = vpow2.f32 %v1327_v2  ;;  %v1305_v60 = vsub.f32 %v4606_v29, %v1255_v4  ;;  %1377 = vadd.xlane.f32.xlu1 %v1376_v7  ;;  %v1302_v32 = vsub.f32 %v4609_v31, %v1246_v27 }
 0x3d7   :  { %v1339_v22 = vmul.f32 1.442695, %v1305_v60  ;;  %v1333_v48 = vmul.f32 1.442695, %v1302_v32 }
 0x3d8   :  { %v1240_v17 = vpop.xlane.xlu1 %1239  ;;  %v1249_v49 = vpop.xlane.xlu0 %1248 }
 0x3d9   :  { %3911 = vpow2.f32 %v1339_v22  ;;  %v1300_v19 = vsub.f32 %v4616_v35, %v1240_v17  ;;  %v1303_v31 = vsub.f32 %v4619_v37, %v1249_v49 }
 0x3db   :  { %v4728_v33 = vpop.eup %3907  ;;  %v1329_v21 = vmul.f32 1.442695, %v1300_v19  ;;  %v1335_v7 = vmul.f32 1.442695, %v1303_v31 }
 0x3dc   :  { %v1258_v43 = vpop.xlane.xlu1 %1257  ;;  %v1394_v36 = vsel %vm1222_vm5, %v4728_v33, 0.0  ;;  %v1261_v60 = vpop.xlane.xlu0 %1260 }
 0x3dd   :  { %3913 = vpow2.f32 %v1329_v21  ;;  %v1306_v28 = vsub.f32 %v4622_v42, %v1258_v43  ;;  %1395 = vadd.xlane.f32.xlu1 %v1394_v36  ;;  %v1307_v17 = vsub.f32 %v4629_v57, %v1261_v60 }
 0x3df   :  { %v4734_v29 = vpop.eup %3909  ;;  %v1341_v26 = vmul.f32 1.442695, %v1306_v28 }
 0x3e0   :  { %v1270_v58 = vpop.xlane.xlu1 %1269  ;;  %v1379_v35 = vsel %vm1222_vm5, %v4734_v29, 0.0  ;;  %v1264_v43 = vpop.xlane.xlu0 %1263 }
 0x3e1   :  { %3915 = vpow2.f32 %v1341_v26  ;;  %v1310_v38 = vsub.f32 %v4636_v14, %v1270_v58  ;;  %1380 = vadd.xlane.f32.xlu1 %v1379_v35 }
 0x3e2   :  { %3917 = vpow2.f32 %v1331_v46 }
 0x3e3   :  { %v4739_v10 = vpop.eup %3911  ;;  %v1349_v42 = vmul.f32 1.442695, %v1310_v38 }
 0x3e4   :  { %v1273_v39 = vpop.xlane.xlu1 %1272  ;;  %v1397_v47 = vsel %vm1222_vm5, %v4739_v10, 0.0  ;;  %v1267_v58 = vpop.xlane.xlu0 %1266 }
 0x3e5   :  { %1398 = vadd.xlane.f32.xlu1 %v1397_v47  ;;  %3919 = vpow2.f32 %v1349_v42  ;;  %v1311_v52 = vsub.f32 %v4646_v24, %v1273_v39 }
 0x3e6   :  { %3921 = vpow2.f32 %v1333_v48 }
 0x3e7   :  { %v4744_v40 = vpop.eup %3913  ;;  %v1351_v56 = vmul.f32 1.442695, %v1311_v52 }
 0x3e8   :  { %v1382_v14 = vsel %vm1222_vm5, %v4744_v40, 0.0  ;;  %v1276_v59 = vpop.xlane.xlu1 %1275 }
 0x3e9   :  { %1383 = vadd.xlane.f32.xlu1 %v1382_v14  ;;  %3923 = vpow2.f32 %v1351_v56  ;;  %v1312_v24 = vsub.f32 %v4652_v45, %v1276_v59  ;;  %v1343_v45 = vmul.f32 1.442695, %v1307_v17  ;;  %v1308_v14 = vsub.f32 %v4639_v15, %v1264_v43 }
 0x3ea   :  { %3925 = vpow2.f32 %v1335_v7 }
 0x3eb   :  { %v4749_v50 = vpop.eup %3915  ;;  %v1353_v19 = vmul.f32 1.442695, %v1312_v24  ;;  %v1345_v59 = vmul.f32 1.442695, %v1308_v14 }
 0x3ec   :  { %v1400_v2 = vsel %vm1222_vm5, %v4749_v50, 0.0  ;;  %v4754_v4 = vpop.eup %3917  ;;  %v1288_v37 = vpop.xlane.xlu1 %1287 }
 0x3ed   :  { %1401 = vadd.xlane.f32.xlu0 %v1400_v2  ;;  %v1385_v22 = vsel %vm1222_vm5, %v4754_v4, 0.0  ;;  %3927 = vpow2.f32 %v1353_v19  ;;  %v1316_v36 = vsub.f32 %v4666_v51, %v1288_v37  ;;  %v1309_v51 = vsub.f32 %v4649_v41, %v1267_v58  ;;  %v1279_v41 = vpop.xlane.xlu0 %1278 }
 0x3ee   :  { %3929 = vpow2.f32 %v1343_v45 }
 0x3ef   :  { %v4759_v30 = vpop.eup %3919  ;;  %v1361_v57 = vmul.f32 1.442695, %v1316_v36  ;;  %v1347_v47 = vmul.f32 1.442695, %v1309_v51 }
 0x3f0   :  { %v1412_v23 = vsel %vm1222_vm5, %v4759_v30, 0.0  ;;  %v4764_v21 = vpop.eup %3921  ;;  %v1291_v28 = vpop.xlane.xlu1 %1290 }
 0x3f1   :  { %1386 = vadd.xlane.f32.xlu0 %v1385_v22  ;;  %v1388_v46 = vsel %vm1222_vm5, %v4764_v21, 0.0  ;;  %v1317_v27 = vsub.f32 %v4676_v6, %v1291_v28  ;;  %3931 = vpow2.f32 %v1361_v57  ;;  %v1282_v24 = vpop.xlane.xlu0 %1281  ;;  %v3857_v57 = vunpack.i.l.bf16 %v4683_v12 }
 0x3f2   :  { %v1314_v15 = vsub.f32 %v4669_v53, %v1282_v24  ;;  %v3862_v24 = vunpack.i.l.bf16 %v4687_v16 }
 0x3f3   :  { %v4769_v26 = vpop.eup %3923  ;;  %v1363_v32 = vmul.f32 1.442695, %v1317_v27 }
 0x3f4   :  { %v1415_v35 = vsel %vm1222_vm5, %v4769_v26, 0.0  ;;  %v4776_v38 = vpop.eup %3925  ;;  %v1294_v42 = vpop.xlane.xlu1 %1293 }
 0x3f5   :  { %1413 = vadd.xlane.f32.xlu0 %v1412_v23  ;;  %v1391_v39 = vsel %vm1222_vm5, %v4776_v38, 0.0  ;;  %3933 = vpow2.f32 %v1363_v32  ;;  %v1318_v6 = vsub.f32 %v4681_v11, %v1294_v42  ;;  %v1313_v11 = vsub.f32 %v4659_v63, %v1279_v41 }
 0x3f6   :  { %3935 = vpow2.f32 %v1347_v47  ;;  %v1357_v63 = vmul.f32 1.442695, %v1314_v15 }
 0x3f7   :  { %v1365_v49 = vmul.f32 1.442695, %v1318_v6  ;;  %v1355_v60 = vmul.f32 1.442695, %v1313_v11 }
 0x3f9   :  { %1389 = vadd.xlane.f32.xlu0 %v1388_v46  ;;  %3937 = vpow2.f32 %v1365_v49  ;;  %v3858_v46 = vunpack.i.h.bf16 %v4683_v12  ;;  %v4840_v49 = vpop.permute.xlu1 %360 }
 0x3fa   :  { %3875 = vrot.lane.b32.xlu1 %v4292_v9, %s4086_s29  ;;  %v4781_v9 = vpop.eup %3927  ;;  %3939 = vpow2.f32 %v1345_v59 }
 0x3fb   :  { %v1418_v48 = vsel %vm1222_vm5, %v4781_v9, 0.0  ;;  %v4786_v52 = vpop.eup %3929  ;;  %v3727_v51 = vpack.c.bf16 %v3858_v46, %v3857_v57 }
 0x3fc   :  { %v1403_v31 = vsel %vm1222_vm5, %v4786_v52, 0.0  ;;  %v4791_v56 = vpop.eup %3931 }
 0x3fd   :  { %1416 = vadd.xlane.f32.xlu0 %v1415_v35  ;;  %v1430_v2 = vsel %vm1222_vm5, %v4791_v56, 0.0  ;;  %v4847_v59 = vpop.permute.xlu1 %3870 }
 0x3ff   :  { %v4796_v7 = vpop.eup %3933 }
 0x400   :  { %v1433_v22 = vsel %vm1222_vm5, %v4796_v7, 0.0  ;;  %v4801_v37 = vpop.eup %3935 }
 0x401   :  { %1392 = vadd.xlane.f32.xlu0 %v1391_v39  ;;  %v1409_v19 = vsel %vm1222_vm5, %v4801_v37, 0.0 }
 0x403   :  { %v4805_v23 = vpop.eup %3937 }
 0x404   :  { %v1436_v53 = vsel %vm1222_vm5, %v4805_v23, 0.0  ;;  %v4810_v28 = vpop.eup %3939 }
 0x405   :  { %1419 = vadd.xlane.f32.xlu0 %v1418_v48  ;;  %v1406_v58 = vsel %vm1222_vm5, %v4810_v28, 0.0 }
 0x409   :  { %1404 = vadd.xlane.f32.xlu0 %v1403_v31 }
 0x40d   :  { %1431 = vadd.xlane.f32.xlu0 %v1430_v2  ;;  %v3863_v2 = vunpack.i.h.bf16 %v4687_v16 }
 0x411   :  { %1434 = vadd.xlane.f32.xlu0 %v1433_v22 }
 0x412   :  { %v1369_v17 = vpop.xlane.xlu0 %1368 }
 0x413   :  { %3941 = vrcp.f32 %v1369_v17  ;;  %v3730_v17 = vpack.c.bf16 %v3863_v2, %v3862_v24 }
 0x414   :  { %3943 = vpow2.f32 %v1355_v60 }
 0x415   :  { %1410 = vadd.xlane.f32.xlu0 %v1409_v19  ;;  %3945 = vpow2.f32 %v1357_v63 }
 0x416   :  { %v1285_v43 = vpop.xlane.xlu0 %1284 }
 0x417   :  { %v1315_v45 = vsub.f32 %v4701_v44, %v1285_v43 }
 0x419   :  { %v1359_v36 = vmul.f32 1.442695, %v1315_v45  ;;  %1437 = vadd.xlane.f32.xlu0 %v1436_v53 }
 0x41a   :  { %v3866_v47 = vpop.permute.xlu0 %3865 }
 0x41b   :  { %3947 = vpow2.f32 %v1359_v36  ;;  %v3868_v46 = vunpack.i.h.bf16 %v3866_v47  ;;  %v3867_v57 = vunpack.i.l.bf16 %v3866_v47 }
 0x41d   :  { %v3942_v27 = vpop.eup %3941 }
 0x41e   :  { %v4816_v35 = vpop.eup %3943  ;;  %v1463_v44 = vmul.f32 %v3942_v27, %v4696_v20  ;;  %1407 = vadd.xlane.f32.xlu1 %v1406_v58 }
 0x41f   :  { %v1421_v32 = vsel %vm1222_vm5, %v4816_v35, 0.0  ;;  %v4824_v12 = vpop.eup %3945 }
 0x420   :  { %3447 = vmatmul.mubr.msk.f32.vlgmr.msra.gmra.mrb[36].mxu0 %vm1222_vm5, %v1463_v44  ;;  %v1424_v20 = vsel %vm1222_vm5, %v4824_v12, 0.0  ;;  %v3736_v44 = vpack.c.bf16 %v3868_v46, %v3867_v57 }
 0x421   :  { %3728 = vmatpush3.bf16.msra.mxu0 %v3727_v51  ;;  %3449 = vmatprep.mubr.msk.f32.mxu0 %vm4076_vm0, %v4075_v1 }
 0x422   :  { %1422 = vadd.xlane.f32.xlu1 %v1421_v32  ;;  %3474 = vmatprep.subr.mxu0 %v4075_v1 }
 0x425   :  { %v4827_v42 = vpop.eup %3947  ;;  %3475 = vmatpush3.msra.mxu0 %v4705_v18 }
 0x426   :  { %1425 = vadd.xlane.f32.xlu1 %v1424_v20  ;;  %v1427_v39 = vsel %vm1222_vm5, %v4827_v42, 0.0  ;;  %3732 = vmatprep.subr.bf16.mxu0 %v4074_v0 }
 0x427   :  { %1428 = vadd.xlane.f32.xlu0 %v1427_v39 }
 0x437   :  { %369 = vrot.lane.b32.xlu1 %v4300_v13, %s4077_s5 }
 0x43d   :  { %378 = vrot.lane.b32.xlu0 %v4300_v13, %s4086_s29 }
 0x44b   :  { %v1372_v6 = vpop.xlane.xlu0 %1371 }
 0x44c   :  { %3949 = vrcp.f32 %v1372_v6 }
 0x44f   :  { %v1375_v18 = vpop.xlane.xlu0 %1374 }
 0x450   :  { %3951 = vrcp.f32 %v1375_v18 }
 0x456   :  { %v3950_v48 = vpop.eup %3949 }
 0x457   :  { %v1464_v41 = vmul.f32 %v3950_v48, %v4711_v3 }
 0x459   :  { %3450 = vmatmul.mubr.msk.f32.gmra.mrb[38].mxu0 %vm1222_vm5, %v1464_v41 }
 0x45a   :  { %v3952_v14 = vpop.eup %3951  ;;  %3452 = vmatprep.mubr.msk.f32.mxu0 %vm4076_vm0, %v4075_v1 }
 0x45b   :  { %v1465_v31 = vmul.f32 %v3952_v14, %v4715_v34 }
 0x45d   :  { %3453 = vmatmul.mubr.msk.f32.gmra.mrb[40].mxu0 %vm1222_vm5, %v1465_v31 }
 0x45e   :  { %3476 = vmatprep.mubr.msk.f32.mxu0 %vm4076_vm0, %v4075_v1 }
 0x462   :  { %v1378_v11 = vpop.xlane.xlu1 %1377 }
 0x463   :  { %3953 = vrcp.f32 %v1378_v11  ;;  %v3873_v11 = vunpack.i.h.bf16 %v4847_v59 }
 0x46a   :  { %v1396_v3 = vpop.xlane.xlu1 %1395 }
 0x46d   :  { %v3954_v60 = vpop.eup %3953 }
 0x46e   :  { %v1466_v15 = vmul.f32 %v3954_v60, %v4722_v62  ;;  %v1381_v22 = vpop.xlane.xlu1 %1380 }
 0x46f   :  { %3955 = vrcp.f32 %v1381_v22 }
 0x470   :  { %3462 = vmatmul.mubr.msk.f32.vlgmr.msra.gmra.mrb[24].mxu1 %vm1222_vm5, %v1466_v15 }
 0x471   :  { %3731 = vmatpush3.bf16.msra.mxu1 %v3730_v17  ;;  %3464 = vmatprep.mubr.msk.f32.mxu1 %vm4076_vm0, %v4075_v1 }
 0x472   :  { %v1399_v34 = vpop.xlane.xlu1 %1398  ;;  %3489 = vmatprep.subr.mxu1 %v4075_v1 }
 0x475   :  { %3490 = vmatpush3.msra.mxu1 %v4689_v25 }
 0x476   :  { %v1384_v63 = vpop.xlane.xlu1 %1383  ;;  %3735 = vmatprep.subr.bf16.mxu1 %v4074_v0 }
 0x477   :  { %3957 = vrcp.f32 %v1384_v63 }
 0x478   :  { %3959 = vrcp.f32 %v1396_v3  ;;  %v3872_v3 = vunpack.i.l.bf16 %v4847_v59 }
 0x479   :  { %v3956_v16 = vpop.eup %3955  ;;  %3961 = vrcp.f32 %v1399_v34 }
 0x47a   :  { %v1402_v62 = vpop.xlane.xlu0 %1401  ;;  %v1467_v19 = vmul.f32 %v3956_v16, %v4734_v29  ;;  %v3739_v24 = vpack.c.bf16 %v3873_v11, %v3872_v3 }
 0x47c   :  { %3465 = vmatmul.mubr.msk.f32.gmra.mrb[26].mxu1 %vm1222_vm5, %v1467_v19 }
 0x47d   :  { %3467 = vmatprep.mubr.msk.f32.mxu1 %vm4076_vm0, %v4075_v1 }
 0x47e   :  { %v1387_v43 = vpop.xlane.xlu0 %1386 }
 0x47f   :  { %3963 = vrcp.f32 %v1387_v43 }
 0x480   :  { %3965 = vrcp.f32 %v1402_v62 }
 0x481   :  { %v3958_v45 = vpop.eup %3957 }
 0x482   :  { %v1414_v25 = vpop.xlane.xlu0 %1413  ;;  %v1468_v53 = vmul.f32 %v3958_v45, %v4744_v40  ;;  %v3960_v36 = vpop.eup %3959 }
 0x483   :  { %3967 = vrcp.f32 %v1414_v25  ;;  %v1472_v29 = vmul.f32 %v3960_v36, %v4728_v33  ;;  %v3962_v58 = vpop.eup %3961  ;;  %v3876_v33 = vpop.permute.xlu1 %3875 }
 0x484   :  { %3468 = vmatmul.mubr.msk.f32.gmra.mrb[28].mxu1 %vm1222_vm5, %v1468_v53  ;;  %v1473_v20 = vmul.f32 %v3962_v58, %v4739_v10  ;;  %v3878_v6 = vunpack.i.h.bf16 %v3876_v33  ;;  %v3877_v18 = vunpack.i.l.bf16 %v3876_v33 }
 0x485   :  { %3491 = vmatprep.mubr.msk.f32.mxu1 %vm4076_vm0, %v4075_v1 }
 0x486   :  { %v1390_v27 = vpop.xlane.xlu0 %1389  ;;  %v3742_v48 = vpack.c.bf16 %v3878_v6, %v3877_v18 }
 0x487   :  { %3969 = vrcp.f32 %v1390_v27 }
 0x488   :  { %3492 = vmatmul.mubr.msk.f32.vlgmr.msra.gmra.mrb[30].mxu1 %vm1222_vm5, %v1472_v29 }
 0x489   :  { %v3964_v51 = vpop.eup %3963  ;;  %3737 = vmatpush3.bf16.msra.mxu1 %v3736_v44  ;;  %3494 = vmatprep.mubr.msk.f32.mxu1 %vm4076_vm0, %v4075_v1 }
 0x48a   :  { %v1469_v40 = vmul.f32 %v3964_v51, %v4754_v4  ;;  %v1417_v32 = vpop.xlane.xlu0 %1416  ;;  %3519 = vmatprep.subr.mxu1 %v4075_v1  ;;  %v3966_v39 = vpop.eup %3965 }
 0x48b   :  { %3971 = vrcp.f32 %v1417_v32  ;;  %v1474_v10 = vmul.f32 %v3966_v39, %v4749_v50 }
 0x48c   :  { %3477 = vmatmul.mubr.msk.f32.vlgmr.msra.gmra.mrb[42].mxu0 %vm1222_vm5, %v1469_v40  ;;  %3495 = vmatmul.mubr.msk.f32.gmra.mrb[32].mxu1 %vm1222_vm5, %v1473_v20 }
 0x48d   :  { %3734 = vmatpush3.bf16.msra.mxu0 %v3733_v8  ;;  %3520 = vmatpush3.msra.mxu1 %v4840_v49  ;;  %v3968_v4 = vpop.eup %3967 }
 0x48e   :  { %v1393_v47 = vpop.xlane.xlu0 %1392  ;;  %3497 = vmatprep.mubr.msk.f32.mxu1 %vm4076_vm0, %v4075_v1  ;;  %3504 = vmatprep.subr.mxu0 %v4075_v1  ;;  %v1478_v5 = vmul.f32 %v3968_v4, %v4759_v30 }
 0x48f   :  { %3973 = vrcp.f32 %v1393_v47  ;;  %3479 = vmatprep.mubr.msk.f32.mxu0 %vm4076_vm0, %v4075_v1  ;;  %3741 = vmatprep.subr.bf16.mxu1 %v4074_v0 }
 0x490   :  { %3498 = vmatmul.mubr.msk.f32.gmra.mrb[34].mxu1 %vm1222_vm5, %v1474_v10 }
 0x491   :  { %v3970_v61 = vpop.eup %3969  ;;  %3505 = vmatpush3.msra.mxu0 %v4300_v13  ;;  %3521 = vmatprep.mubr.msk.f32.mxu1 %vm4076_vm0, %v4075_v1 }
 0x492   :  { %v1420_v8 = vpop.xlane.xlu0 %1419  ;;  %v1470_v50 = vmul.f32 %v3970_v61, %v4764_v21  ;;  %3738 = vmatprep.subr.bf16.mxu0 %v4074_v0 }
 0x493   :  { %3975 = vrcp.f32 %v1420_v8 }
 0x494   :  { %3480 = vmatmul.mubr.msk.f32.gmra.mrb[44].mxu0 %vm1222_vm5, %v1470_v50  ;;  %3522 = vmatmul.mubr.msk.f32.vlgmr.msra.gmra.mrb[36].mxu1 %vm1222_vm5, %v1478_v5 }
 0x495   :  { %v3972_v41 = vpop.eup %3971  ;;  %3743 = vmatpush3.bf16.msra.mxu1 %v3742_v48  ;;  %3524 = vmatprep.mubr.msk.f32.mxu1 %vm4076_vm0, %v4075_v1 }
 0x496   :  { %v1405_v13 = vpop.xlane.xlu0 %1404  ;;  %v1479_v49 = vmul.f32 %v3972_v41, %v4769_v26  ;;  %3482 = vmatprep.mubr.msk.f32.mxu0 %vm4076_vm0, %v4075_v1  ;;  %3549 = vmatprep.subr.mxu1 %v4075_v1 }
 0x497   :  { %3977 = vrcp.f32 %v1405_v13 }
 0x498   :  { %3525 = vmatmul.mubr.msk.f32.gmra.mrb[38].mxu1 %vm1222_vm5, %v1479_v49 }
 0x499   :  { %v3974_v30 = vpop.eup %3973  ;;  %3527 = vmatprep.mubr.msk.f32.mxu1 %vm4076_vm0, %v4075_v1 }
 0x49a   :  { %v1471_v21 = vmul.f32 %v3974_v30, %v4776_v38  ;;  %v1432_v26 = vpop.xlane.xlu0 %1431 }
 0x49b   :  { %3979 = vrcp.f32 %v1432_v26 }
 0x49c   :  { %3483 = vmatmul.mubr.msk.f32.gmra.mrb[46].mxu0 %vm1222_vm5, %v1471_v21 }
 0x49d   :  { %v3976_v14 = vpop.eup %3975  ;;  %3506 = vmatprep.mubr.msk.f32.mxu0 %vm4076_vm0, %v4075_v1 }
 0x49e   :  { %v1480_v31 = vmul.f32 %v3976_v14, %v4781_v9  ;;  %v1435_v60 = vpop.xlane.xlu0 %1434 }
 0x4a0   :  { %3528 = vmatmul.mubr.msk.f32.gmra.mrb[40].mxu1 %vm1222_vm5, %v1480_v31 }
 0x4a1   :  { %v3978_v2 = vpop.eup %3977  ;;  %3551 = vmatprep.mubr.msk.f32.mxu1 %vm4076_vm0, %v4075_v1 }
 0x4a2   :  { %v1475_v38 = vmul.f32 %v3978_v2, %v4786_v52  ;;  %v1411_v9 = vpop.xlane.xlu0 %1410 }
 0x4a4   :  { %3507 = vmatmul.mubr.msk.f32.vlgmr.msra.gmra.mrb[48].mxu0 %vm1222_vm5, %v1475_v38 }
 0x4a5   :  { %3740 = vmatpush3.bf16.msra.mxu0 %v3739_v24  ;;  %3509 = vmatprep.mubr.msk.f32.mxu0 %vm4076_vm0, %v4075_v1  ;;  %v3980_v34 = vpop.eup %3979 }
 0x4a6   :  { %3534 = vmatprep.subr.mxu0 %v4075_v1  ;;  %v1438_v22 = vpop.xlane.xlu0 %1437  ;;  %v1484_v43 = vmul.f32 %v3980_v34, %v4791_v56 }
 0x4ab   :  { %v1408_v59 = vpop.xlane.xlu1 %1407 }
 0x4ac   :  { %3981 = vrcp.f32 %v1408_v59 }
 0x4ad   :  { %3983 = vrcp.f32 %v1411_v9 }
 0x4ae   :  { %3985 = vrcp.f32 %v1435_v60 }
 0x4af   :  { %v1423_v15 = vpop.xlane.xlu1 %1422 }
 0x4b0   :  { %3987 = vrcp.f32 %v1423_v15 }
 0x4b1   :  { %3989 = vrcp.f32 %v1438_v22 }
 0x4b3   :  { %v1426_v52 = vpop.xlane.xlu1 %1425 }
 0x4b4   :  { %v1429_v17 = vpop.xlane.xlu0 %1428  ;;  %3991 = vrcp.f32 %v1426_v52 }
 0x4b5   :  { %3993 = vrcp.f32 %v1429_v17 }
 0x4b6   :  { %v3982_v63 = vpop.eup %3981 }
 0x4b7   :  { %v370_v16 = vpop.permute.xlu1 %369  ;;  %v1476_v62 = vmul.f32 %v3982_v63, %v4810_v28  ;;  %v3984_v19 = vpop.eup %3983 }
 0x4b8   :  { %v379_v45 = vpop.permute.xlu0 %378  ;;  %3535 = vmatpush3.msra.mxu0 %v370_v16  ;;  %v3986_v25 = vpop.eup %3985  ;;  %v1477_v28 = vmul.f32 %v3984_v19, %v4801_v37 }
 0x4b9   :  { %3550 = vmatpush3.msra.mxu1 %v379_v45  ;;  %3510 = vmatmul.mubr.msk.f32.gmra.mrb[50].mxu0 %vm1222_vm5, %v1476_v62  ;;  %v1485_v53 = vmul.f32 %v3986_v25, %v4796_v7 }
 0x4ba   :  { %3552 = vmatmul.mubr.msk.f32.vlgmr.msra.gmra.mrb[42].mxu1 %vm1222_vm5, %v1484_v43  ;;  %3512 = vmatprep.mubr.msk.f32.mxu0 %vm4076_vm0, %v4075_v1  ;;  %v3988_v56 = vpop.eup %3987 }
 0x4bb   :  { %3554 = vmatprep.mubr.msk.f32.mxu1 %vm4076_vm0, %v4075_v1  ;;  %3744 = vmatprep.subr.bf16.mxu0 %v4074_v0  ;;  %v3990_v36 = vpop.eup %3989  ;;  %v1481_v46 = vmul.f32 %v3988_v56, %v4816_v35 }
 0x4bc   :  { %3750 = vmatprep.subr.bf16.mxu1 %v4074_v0  ;;  %v1486_v57 = vmul.f32 %v3990_v36, %v4805_v23 }
 0x4bd   :  { %3513 = vmatmul.mubr.msk.f32.gmra.mrb[52].mxu0 %vm1222_vm5, %v1477_v28 }
 0x4be   :  { %3555 = vmatmul.mubr.msk.f32.gmra.mrb[44].mxu1 %vm1222_vm5, %v1485_v53  ;;  %3536 = vmatprep.mubr.msk.f32.mxu0 %vm4076_vm0, %v4075_v1  ;;  %v3992_v37 = vpop.eup %3991 }
 0x4bf   :  { %3557 = vmatprep.mubr.msk.f32.mxu1 %vm4076_vm0, %v4075_v1  ;;  %v1482_v7 = vmul.f32 %v3992_v37, %v4824_v12  ;;  %v3994_v29 = vpop.eup %3993 }
 0x4c0   :  { %v1483_v23 = vmul.f32 %v3994_v29, %v4827_v42 }
 0x4c1   :  { %3537 = vmatmul.mubr.msk.f32.vlgmr.msra.gmra.mrb[54].mxu0 %vm1222_vm5, %v1481_v46 }
 0x4c2   :  { %3558 = vmatmul.mubr.msk.f32.gmra.mrb[46].mxu1 %vm1222_vm5, %v1486_v57  ;;  %3539 = vmatprep.mubr.msk.f32.mxu0 %vm4076_vm0, %v4075_v1 }
 0x4c3   :  { %3593 = vmatprep.mubr.msk.f32.mxu1 %vm4076_vm0, %v4075_v1 }
 0x4c5   :  { %3540 = vmatmul.mubr.msk.f32.gmra.mrb[56].mxu0 %vm1222_vm5, %v1482_v7 }
 0x4c6   :  { %3542 = vmatprep.mubr.msk.f32.mxu0 %vm4076_vm0, %v4075_v1 }
 0x4c9   :  { %3543 = vmatmul.mubr.msk.f32.gmra.mrb[58].mxu0 %vm1222_vm5, %v1483_v23 }
 0x4ca   :  { %3568 = vmatprep.mubr.msk.f32.mxu0 %vm4076_vm0, %v4075_v1 }
 0x4f3   :  { %v1562_v35 = vpop.f32.mrb[36].mxu0 }
 0x4f4   :  { %v3448_v27 = vpop.f32.mrb[37].mxu0  ;;  %v2199_v32 = vsel %vm70_vm1, %v1562_v35, 0.0 }
 0x52c   :  { %v1567_v58 = vpop.f32.mrb[38].mxu0 }
 0x52d   :  { %v3451_v12 = vpop.f32.mrb[39].mxu0  ;;  %v2214_v42 = vsel %vm70_vm1, %v1567_v58, 0.0 }
 0x530   :  { %v1572_v44 = vpop.f32.mrb[40].mxu0 }
 0x531   :  { %v3454_v51 = vpop.f32.mrb[41].mxu0  ;;  %v2229_v61 = vsel %vm70_vm1, %v1572_v44, 0.0 }
 0x543   :  { %v1651_v40 = vpop.f32.mrb[24].mxu1 }
 0x544   :  { %v2200_v20 = vsel %vm70_vm1, %v1651_v40, 0.0  ;;  %v3463_v39 = vpop.f32.mrb[25].mxu1 }
 0x545   :  { %v2201_v33 = vadd.f32 %v2200_v20, %v2199_v32 }
 0x54f   :  { %v1656_v47 = vpop.f32.mrb[26].mxu1 }
 0x550   :  { %v2215_v10 = vsel %vm70_vm1, %v1656_v47, 0.0  ;;  %v3466_v4 = vpop.f32.mrb[27].mxu1  ;;  %v2246_v47 = vsub.s32 2, %v4263_v54 }
 0x551   :  { %v2216_v6 = vadd.f32 %v2215_v10, %v2214_v42 }
 0x557   :  { %v1661_v18 = vpop.f32.mrb[28].mxu1 }
 0x558   :  { %v2230_v5 = vsel %vm70_vm1, %v1661_v18, 0.0  ;;  %v3469_v8 = vpop.f32.mrb[29].mxu1 }
 0x559   :  { %v2231_v50 = vadd.f32 %v2230_v5, %v2229_v61  ;;  %v4975_v8 = vld [vmem:[#allocation2] sm:$0xff] }
 0x55b   :  { %v1829_v48 = vpop.f32.mrb[30].mxu1 }
 0x55c   :  { %v3493_v41 = vpop.f32.mrb[31].mxu1  ;;  %v2204_v31 = vsel %vm70_vm1, %v1829_v48, 0.0 }
 0x55f   :  { %v1740_v13 = vpop.f32.mrb[42].mxu0  ;;  %v1834_v49 = vpop.f32.mrb[32].mxu1 }
 0x560   :  { %v2202_v30 = vsel %vm70_vm1, %v1740_v13, 0.0  ;;  %v3478_v21 = vpop.f32.mrb[43].mxu0  ;;  %v3496_v14 = vpop.f32.mrb[33].mxu1  ;;  %v2219_v22 = vsel %vm70_vm1, %v1834_v49, 0.0 }
 0x561   :  { %v2203_v26 = vadd.f32 %v2202_v30, %v2201_v33 }
 0x563   :  { %v1839_v11 = vpop.f32.mrb[34].mxu1  ;;  %v2205_v3 = vadd.f32 %v2204_v31, %v2203_v26 }
 0x564   :  { %v3499_v2 = vpop.f32.mrb[35].mxu1  ;;  %v2234_v43 = vsel %vm70_vm1, %v1839_v11, 0.0 }
 0x567   :  { %v1745_v38 = vpop.f32.mrb[44].mxu0  ;;  %v2007_v24 = vpop.f32.mrb[36].mxu1 }
 0x568   :  { %v2217_v60 = vsel %vm70_vm1, %v1745_v38, 0.0  ;;  %v3481_v9 = vpop.f32.mrb[45].mxu0  ;;  %v3523_v59 = vpop.f32.mrb[37].mxu1  ;;  %v2208_v37 = vsel %vm70_vm1, %v2007_v24, 0.0 }
 0x569   :  { %v2218_v15 = vadd.f32 %v2217_v60, %v2216_v6 }
 0x56b   :  { %v2012_v52 = vpop.f32.mrb[38].mxu1  ;;  %v2220_v17 = vadd.f32 %v2219_v22, %v2218_v15 }
 0x56c   :  { %v3526_v34 = vpop.f32.mrb[39].mxu1  ;;  %v2223_v12 = vsel %vm70_vm1, %v2012_v52, 0.0  ;;  %v4991_v52 = vld [vmem:[%s5309_s0] sm:$0xff] }
 0x56f   :  { %v1750_v63 = vpop.f32.mrb[46].mxu0 }
 0x570   :  { %v2232_v16 = vsel %vm70_vm1, %v1750_v63, 0.0  ;;  %v3484_v62 = vpop.f32.mrb[47].mxu0  ;;  %v4998_v63 = vld [vmem:[%s5309_s0 + $0x8] sm:$0xff] }
 0x571   :  { %v2233_v19 = vadd.f32 %v2232_v16, %v2231_v50  ;;  %v2247_v50 = vrot.slane %v4975_v8, %v2246_v47 }
 0x573   :  { %v2017_v45 = vpop.f32.mrb[40].mxu1  ;;  %v2235_v25 = vadd.f32 %v2234_v43, %v2233_v19  ;;  %v5005_v19 = vld [vmem:[%s5309_s0 + $0x10] sm:$0xff] }
 0x574   :  { %v3529_v28 = vpop.f32.mrb[41].mxu1  ;;  %v2238_v42 = vsel %vm70_vm1, %v2017_v45, 0.0 }
 0x577   :  { %v1918_v56 = vpop.f32.mrb[48].mxu0 }
 0x578   :  { %v2206_v53 = vsel %vm70_vm1, %v1918_v56, 0.0  ;;  %v3508_v36 = vpop.f32.mrb[49].mxu0 }
 0x579   :  { %v2207_v46 = vadd.f32 %v2206_v53, %v2205_v3 }
 0x57b   :  { %v2209_v57 = vadd.f32 %v2208_v37, %v2207_v46 }
 0x58c   :  { %v1923_v7 = vpop.f32.mrb[50].mxu0 }
 0x58d   :  { %v2221_v29 = vsel %vm70_vm1, %v1923_v7, 0.0  ;;  %v2185_v23 = vpop.f32.mrb[42].mxu1  ;;  %v3511_v35 = vpop.f32.mrb[51].mxu0 }
 0x58e   :  { %v2222_v27 = vadd.f32 %v2221_v29, %v2220_v17  ;;  %v3553_v58 = vpop.f32.mrb[43].mxu1  ;;  %v2212_v41 = vsel %vm70_vm1, %v2185_v23, 0.0 }
 0x590   :  { %v1928_v44 = vpop.f32.mrb[52].mxu0  ;;  %v2224_v51 = vadd.f32 %v2223_v12, %v2222_v27 }
 0x591   :  { %v2236_v40 = vsel %vm70_vm1, %v1928_v44, 0.0  ;;  %v2190_v32 = vpop.f32.mrb[44].mxu1  ;;  %v3514_v20 = vpop.f32.mrb[53].mxu0 }
 0x592   :  { %v2237_v39 = vadd.f32 %v2236_v40, %v2235_v25  ;;  %v3556_v33 = vpop.f32.mrb[45].mxu1  ;;  %v2227_v31 = vsel %vm70_vm1, %v2190_v32, 0.0 }
 0x594   :  { %v2096_v10 = vpop.f32.mrb[54].mxu0  ;;  %v2239_v4 = vadd.f32 %v2238_v42, %v2237_v39 }
 0x595   :  { %v2210_v6 = vsel %vm70_vm1, %v2096_v10, 0.0  ;;  %v2195_v18 = vpop.f32.mrb[46].mxu1  ;;  %v3538_v61 = vpop.f32.mrb[55].mxu0  ;;  %v2332_v10 = vsub.s32 4, %v4263_v54 }
 0x596   :  { %v2211_v5 = vadd.f32 %v2210_v6, %v2209_v57  ;;  %v3559_v48 = vpop.f32.mrb[47].mxu1  ;;  %v2242_v9 = vsel %vm70_vm1, %v2195_v18, 0.0  ;;  %v2343_v6 = vsub.s32 5, %v4263_v54  ;;  %v2353_v61 = vld [vmem:[%s5312_s3 + $0x8] sm:$0xff] }
 0x598   :  { %v2213_v13 = vadd.f32 %v2212_v41, %v2211_v5  ;;  %v2101_v49 = vpop.f32.mrb[56].mxu0  ;;  %v2344_v18 = vrot.slane %v4975_v8, %v2343_v6  ;;  %v2355_v5 = vld [vmem:[%s5312_s3 + $0x18] sm:$0xff] }
 0x599   :  { %v2225_v30 = vsel %vm70_vm1, %v2101_v49, 0.0  ;;  %v3541_v21 = vpop.f32.mrb[57].mxu0  ;;  %v3745_v48 = vpack.c.bf16 %v2355_v5, %v2353_v61  ;;  %v2359_v41 = vld [vmem:[%s5312_s3 + $0x38] sm:$0xff] }
 0x59a   :  { %v2248_v14 = vadd.f32 %v2247_v50, %v2213_v13  ;;  %v2226_v26 = vadd.f32 %v2225_v30, %v2224_v51 }
 0x59b   :  { %3746 = vmatpush3.bf16.msra.mxu0 %v3745_v48 }
 0x59c   :  { %v2228_v11 = vadd.f32 %v2227_v31, %v2226_v26  ;;  %2254 = vrot.lane.b32.xlu1 %v2248_v14, %s4077_s5  ;;  %v2106_v3 = vpop.f32.mrb[58].mxu0  ;;  %3747 = vmatprep.subr.bf16.mxu0 %v4074_v0 }
 0x59d   :  { %v2240_v2 = vsel %vm70_vm1, %v2106_v3, 0.0  ;;  %v3544_v38 = vpop.f32.mrb[59].mxu0 }
 0x59e   :  { %v2249_v24 = vadd.f32 %v2247_v50, %v2228_v11  ;;  %v2241_v60 = vadd.f32 %v2240_v2, %v2239_v4  ;;  %v2333_v4 = vrot.slane %v4975_v8, %v2332_v10 }
 0x5a0   :  { %v2243_v59 = vadd.f32 %v2242_v9, %v2241_v60  ;;  %2256 = vrot.lane.b32.xlu1 %v2249_v24, %s4077_s5 }
 0x5a2   :  { %v2250_v15 = vadd.f32 %v2247_v50, %v2243_v59  ;;  %v2357_v50 = vld [vmem:[%s5312_s3 + $0x28] sm:$0xff] }
 0x5a3   :  { %v3748_v13 = vpack.c.bf16 %v2359_v41, %v2357_v50 }
 0x5a4   :  { %2258 = vrot.lane.b32.xlu1 %v2250_v15, %s4077_s5 }
 0x5a5   :  { %3749 = vmatpush3.bf16.msra.mxu0 %v3748_v13 }
 0x5a6   :  { %3762 = vmatprep.subr.bf16.mxu0 %v4074_v0 }
 0x60e   :  { %v2255_v22 = vpop.permute.xlu1 %2254 }
 0x60f   :  { %v2263_v17 = vadd.f32 %v4991_v52, %v2255_v22 }
 0x611   :  { %2269 = vrot.lane.b32.xlu1 %v2263_v17, %s4077_s5 }
 0x612   :  { %v2257_v34 = vpop.permute.xlu1 %2256 }
 0x613   :  { %v2264_v16 = vadd.f32 %v4998_v63, %v2257_v34 }
 0x615   :  { %2271 = vrot.lane.b32.xlu1 %v2264_v16, %s4077_s5 }
 0x616   :  { %v2259_v62 = vpop.permute.xlu1 %2258 }
 0x617   :  { %v2265_v43 = vadd.f32 %v5005_v19, %v2259_v62  ;;  %v5049_v62 = vld [vmem:[%s5313_s4] sm:$0xff] }
 0x619   :  { %2273 = vrot.lane.b32.xlu0 %v2265_v43, %s4077_s5 }
 0x683   :  { %v2270_v45 = vpop.permute.xlu1 %2269 }
 0x684   :  { %v2278_v25 = vsel %vm70_vm1, %v2270_v45, 0.0 }
 0x685   :  { %2279 = vadd.xlane.f32.xlu1 %v2278_v25 }
 0x687   :  { %v2272_v28 = vpop.permute.xlu1 %2271 }
 0x688   :  { %v2281_v56 = vsel %vm70_vm1, %v2272_v28, 0.0 }
 0x689   :  { %2282 = vadd.xlane.f32.xlu0 %v2281_v56 }
 0x68b   :  { %v2274_v53 = vpop.permute.xlu0 %2273 }
 0x68c   :  { %v2284_v36 = vsel %vm70_vm1, %v2274_v53, 0.0  ;;  %v5065_v53 = vld [vmem:[%s5313_s4 + $0x10] sm:$0xff] }
 0x68d   :  { %2285 = vadd.xlane.f32.xlu0 %v2284_v36  ;;  %v5070_v36 = vld [vmem:[%s5313_s4 + $0x18] sm:$0xff] }
 0x712   :  { %v2280_v46 = vpop.xlane.xlu1 %2279 }
 0x713   :  { %v2288_v37 = vmul.f32 0.03125, %v2280_v46  ;;  %v5075_v46 = vld [vmem:[%s5313_s4 + $0x20] sm:$0xff] }
 0x715   :  { %v2291_v57 = vsub.f32 %v2263_v17, %v2288_v37  ;;  %v5080_v37 = vld [vmem:[%s5313_s4 + $0x28] sm:$0xff] }
 0x716   :  { %v2283_v7 = vpop.xlane.xlu0 %2282 }
 0x717   :  { %v2294_v29 = vmul.f32 %v2291_v57, %v2291_v57  ;;  %v2289_v23 = vmul.f32 0.03125, %v2283_v7  ;;  %v3884_v7 = vpack.i.bf16 %v5070_v36, %v5065_v53 }
 0x719   :  { %v2292_v35 = vsub.f32 %v2264_v16, %v2289_v23  ;;  %2300 = vrot.lane.b32.xlu1 %v2294_v29, %s4077_s5  ;;  %v3889_v29 = vpack.i.bf16 %v5080_v37, %v5075_v46  ;;  %v5094_v23 = vld [vmem:[%s5313_s4 + $0x30] sm:$0xff] }
 0x71a   :  { %v2286_v27 = vpop.xlane.xlu0 %2285 }
 0x71b   :  { %v2295_v58 = vmul.f32 %v2292_v35, %v2292_v35  ;;  %v2290_v12 = vmul.f32 0.03125, %v2286_v27 }
 0x71d   :  { %v2293_v44 = vsub.f32 %v2265_v43, %v2290_v12  ;;  %2302 = vrot.lane.b32.xlu0 %v2295_v58, %s4077_s5  ;;  %v5054_v43 = vld [vmem:[%s5313_s4 + $0x8] sm:$0xff] }
 0x71e   :  { %v3879_v56 = vpack.i.bf16 %v5054_v43, %v5049_v62 }
 0x71f   :  { %v2296_v51 = vmul.f32 %v2293_v44, %v2293_v44 }
 0x721   :  { %2304 = vrot.lane.b32.xlu1 %v2296_v51, %s4077_s5 }
 0x78b   :  { %v2301_v40 = vpop.permute.xlu1 %2300 }
 0x78c   :  { %v2309_v32 = vsel %vm70_vm1, %v2301_v40, 0.0 }
 0x78d   :  { %2310 = vadd.xlane.f32.xlu1 %v2309_v32 }
 0x78f   :  { %v2303_v20 = vpop.permute.xlu0 %2302 }
 0x790   :  { %v2312_v39 = vsel %vm70_vm1, %v2303_v20, 0.0 }
 0x791   :  { %2313 = vadd.xlane.f32.xlu0 %v2312_v39 }
 0x793   :  { %v2305_v33 = vpop.permute.xlu1 %2304 }
 0x794   :  { %v2315_v42 = vsel %vm70_vm1, %v2305_v33, 0.0 }
 0x795   :  { %2316 = vadd.xlane.f32.xlu0 %v2315_v42 }
 0x79e   :  { %2335 = vrot.lane.b32.xlu1 %v2333_v4, %s4077_s5 }
 0x7ab   :  { %2346 = vrot.lane.b32.xlu0 %v2344_v18, %s4077_s5 }
 0x81a   :  { %v2311_v49 = vpop.xlane.xlu1 %2310 }
 0x81b   :  { %v2318_v30 = vmul.f32 0.03125, %v2311_v49 }
 0x81d   :  { %v2321_v21 = vadd.f32 1e-05, %v2318_v30  ;;  %v2378_v30 = vsub.s32 1, %v4263_v54 }
 0x81e   :  { %v2314_v14 = vpop.xlane.xlu0 %2313  ;;  %v2336_v24 = vpop.permute.xlu1 %2335 }
 0x81f   :  { %3995 = vrsqrt.f32 %v2321_v21  ;;  %v2319_v26 = vmul.f32 0.03125, %v2314_v14  ;;  %v2379_v21 = vrot.slane %v4975_v8, %v2378_v30 }
 0x821   :  { %v2322_v31 = vadd.f32 1e-05, %v2319_v26 }
 0x822   :  { %v2317_v11 = vpop.xlane.xlu0 %2316 }
 0x823   :  { %3997 = vrsqrt.f32 %v2322_v31  ;;  %v2320_v3 = vmul.f32 0.03125, %v2317_v11 }
 0x825   :  { %v2323_v2 = vadd.f32 1e-05, %v2320_v3 }
 0x826   :  { %v2347_v9 = vpop.permute.xlu0 %2346 }
 0x827   :  { %3999 = vrsqrt.f32 %v2323_v2 }
 0x829   :  { %v3996_v38 = vpop.eup %3995 }
 0x82a   :  { %v2327_v60 = vmul.f32 %v3996_v38, %v2291_v57 }
 0x82c   :  { %v2338_v59 = vmul.f32 %v2336_v24, %v2327_v60 }
 0x82d   :  { %v3998_v15 = vpop.eup %3997 }
 0x82e   :  { %v2328_v22 = vmul.f32 %v3998_v15, %v2292_v35  ;;  %v5042_v17 = vadd.f32 %v2347_v9, %v2338_v59  ;;  %v5099_v35 = vld [vmem:[%s5313_s4 + $0x38] sm:$0xff] }
 0x82f   :  { %v3894_v27 = vpack.i.bf16 %v5099_v35, %v5094_v23 }
 0x830   :  { %v2339_v34 = vmul.f32 %v2336_v24, %v2328_v22  ;;  %2383 = vrot.lane.b32.xlu1 %v5042_v17, %s4077_s5  ;;  %v2480_v22 = vsub.s32 3, %v4263_v54 }
 0x831   :  { %v4000_v16 = vpop.eup %3999 }
 0x832   :  { %v2329_v45 = vmul.f32 %v4000_v16, %v2293_v44  ;;  %v5056_v25 = vadd.f32 %v2347_v9, %v2339_v34  ;;  %v2481_v34 = vrot.slane %v4975_v8, %v2480_v22 }
 0x834   :  { %v2340_v28 = vmul.f32 %v2336_v24, %v2329_v45  ;;  %2385 = vrot.lane.b32.xlu1 %v5056_v25, %s4077_s5 }
 0x836   :  { %v5082_v57 = vadd.f32 %v2347_v9, %v2340_v28 }
 0x838   :  { %2387 = vrot.lane.b32.xlu0 %v5082_v57, %s4077_s5  ;;  %3880 = vrot.lane.b32.xlu1 %v3879_v56, %s4077_s5 }
 0x83c   :  { %3885 = vrot.lane.b32.xlu0 %v3884_v7, %s4077_s5  ;;  %3890 = vrot.lane.b32.xlu1 %v3889_v29, %s4077_s5 }
 0x840   :  { %3895 = vrot.lane.b32.xlu0 %v3894_v27, %s4077_s5 }
 0x8a2   :  { %v2384_v58 = vpop.permute.xlu1 %2383 }
 0x8a3   :  { %3569 = vmatmul.mubr.msk.f32.vlgmr.msra.gmra.mrb[60].mxu0 %vm70_vm1, %v2384_v58 }
 0x8a4   :  { %3571 = vmatprep.mubr.msk.f32.mxu0 %vm4076_vm0, %v4075_v1 }
 0x8a6   :  { %v2386_v12 = vpop.permute.xlu1 %2385 }
 0x8a7   :  { %3572 = vmatmul.mubr.msk.f32.gmra.mrb[62].mxu0 %vm70_vm1, %v2386_v12 }
 0x8a8   :  { %3574 = vmatprep.mubr.msk.f32.mxu0 %vm4076_vm0, %v4075_v1 }
 0x8aa   :  { %v2388_v44 = vpop.permute.xlu0 %2387  ;;  %v3881_v51 = vpop.permute.xlu1 %3880 }
 0x8ab   :  { %3575 = vmatmul.mubr.msk.f32.gmra.mrb[64].mxu0 %vm70_vm1, %v2388_v44  ;;  %v3883_v40 = vunpack.i.h.bf16 %v3881_v51  ;;  %v3882_v32 = vunpack.i.l.bf16 %v3881_v51 }
 0x8ac   :  { %3610 = vmatprep.mubr.msk.f32.mxu0 %vm4076_vm0, %v4075_v1 }
 0x8ad   :  { %v3751_v20 = vpack.c.bf16 %v3883_v40, %v3882_v32 }
 0x8ae   :  { %v3886_v39 = vpop.permute.xlu0 %3885  ;;  %v3891_v33 = vpop.permute.xlu1 %3890 }
 0x8af   :  { %v3888_v42 = vunpack.i.h.bf16 %v3886_v39  ;;  %v3887_v4 = vunpack.i.l.bf16 %v3886_v39  ;;  %3752 = vmatpush3.bf16.msra.mxu1 %v3751_v20  ;;  %v3893_v18 = vunpack.i.h.bf16 %v3891_v33  ;;  %v3892_v61 = vunpack.i.l.bf16 %v3891_v33 }
 0x8b0   :  { %3753 = vmatprep.subr.bf16.mxu1 %v4074_v0 }
 0x8b1   :  { %v3754_v5 = vpack.c.bf16 %v3888_v42, %v3887_v4  ;;  %v3757_v48 = vpack.c.bf16 %v3893_v18, %v3892_v61 }
 0x8b2   :  { %v3896_v50 = vpop.permute.xlu0 %3895 }
 0x8b3   :  { %3755 = vmatpush3.bf16.msra.mxu1 %v3754_v5  ;;  %v3898_v41 = vunpack.i.h.bf16 %v3896_v50  ;;  %v3897_v13 = vunpack.i.l.bf16 %v3896_v50 }
 0x8b4   :  { %3756 = vmatprep.subr.bf16.mxu1 %v4074_v0 }
 0x8b5   :  { %v3760_v49 = vpack.c.bf16 %v3898_v41, %v3897_v13 }
 0x8b7   :  { %3758 = vmatpush3.bf16.msra.mxu1 %v3757_v48 }
 0x8b8   :  { %3759 = vmatprep.subr.bf16.mxu1 %v4074_v0 }
 0x8bb   :  { %3761 = vmatpush3.bf16.msra.mxu1 %v3760_v49 }
 0x8bc   :  { %3768 = vmatprep.subr.bf16.mxu1 %v4074_v0 }
 0x976   :  { %v2461_v14 = vpop.f32.mrb[60].mxu0 }
 0x977   :  { %v2462_v26 = vadd.f32 %v2461_v14, %v2379_v21  ;;  %v3570_v31 = vpop.f32.mrb[61].mxu0 }
 0x979   :  { %v2475_v11 = vmax.f32 %v2462_v26, 0.0 }
 0x97a   :  { %v2466_v3 = vpop.f32.mrb[62].mxu0 }
 0x97b   :  { %v2467_v2 = vadd.f32 %v2466_v3, %v2379_v21  ;;  %v3573_v38 = vpop.f32.mrb[63].mxu0  ;;  %3594 = vmatmul.mubr.msk.f32.vlgmr.msra.gmra.mrb[48].mxu1 %vm98_vm2, %v2475_v11 }
 0x97c   :  { %3596 = vmatprep.mubr.msk.f32.mxu1 %vm4076_vm0, %v4075_v1 }
 0x97d   :  { %v2476_v24 = vmax.f32 %v2467_v2, 0.0 }
 0x97e   :  { %v2471_v60 = vpop.f32.mrb[64].mxu0 }
 0x97f   :  { %v2472_v9 = vadd.f32 %v2471_v60, %v2379_v21  ;;  %v3576_v59 = vpop.f32.mrb[65].mxu0  ;;  %3597 = vmatmul.mubr.msk.f32.gmra.mrb[50].mxu1 %vm98_vm2, %v2476_v24 }
 0x980   :  { %3599 = vmatprep.mubr.msk.f32.mxu1 %vm4076_vm0, %v4075_v1 }
 0x981   :  { %v2477_v15 = vmax.f32 %v2472_v9, 0.0  ;;  %v2683_v9 = vsub.s32 6, %v4263_v54 }
 0x983   :  { %3600 = vmatmul.mubr.msk.f32.gmra.mrb[52].mxu1 %vm98_vm2, %v2477_v15  ;;  %v2684_v59 = vrot.slane %v4975_v8, %v2683_v9  ;;  %v2694_v15 = vsub.s32 7, %v4263_v54 }
 0x984   :  { %3651 = vmatprep.mubr.msk.f32.mxu1 %vm4076_vm0, %v4075_v1 }
 0xa4e   :  { %v2589_v16 = vpop.f32.mrb[48].mxu1 }
 0xa4f   :  { %v2590_v45 = vadd.f32 %v2589_v16, %v2481_v34  ;;  %v3595_v28 = vpop.f32.mrb[49].mxu1  ;;  %v2352_v16 = vld [vmem:[%s5312_s3] sm:$0xff] }
 0xa50   :  { %v2356_v28 = vld [vmem:[%s5312_s3 + $0x20] sm:$0xff] }
 0xa51   :  { %2606 = vrot.lane.b32.xlu1 %v2590_v45, %s4077_s5  ;;  %v2354_v45 = vld [vmem:[%s5312_s3 + $0x10] sm:$0xff] }
 0xa52   :  { %v2594_v56 = vpop.f32.mrb[50].mxu1 }
 0xa53   :  { %v2595_v7 = vadd.f32 %v2594_v56, %v2481_v34  ;;  %v3598_v29 = vpop.f32.mrb[51].mxu1  ;;  %v3763_v56 = vpack.c.bf16 %v2354_v45, %v2352_v16 }
 0xa55   :  { %2608 = vrot.lane.b32.xlu0 %v2595_v7, %s4077_s5  ;;  %v2358_v7 = vld [vmem:[%s5312_s3 + $0x30] sm:$0xff]  ;;  %3764 = vmatpush3.bf16.msra.mxu0 %v3763_v56 }
 0xa56   :  { %v2599_v27 = vpop.f32.mrb[52].mxu1  ;;  %3765 = vmatprep.subr.bf16.mxu0 %v4074_v0 }
 0xa57   :  { %v2600_v58 = vadd.f32 %v2599_v27, %v2481_v34  ;;  %v3601_v12 = vpop.f32.mrb[53].mxu1  ;;  %v2695_v34 = vrot.slane %v4975_v8, %v2694_v15  ;;  %v3766_v8 = vpack.c.bf16 %v2358_v7, %v2356_v28 }
 0xa59   :  { %2610 = vrot.lane.b32.xlu1 %v2600_v58, %s4077_s5  ;;  %3767 = vmatpush3.bf16.msra.mxu0 %v3766_v8 }
 0xac3   :  { %v2607_v44 = vpop.permute.xlu1 %2606 }
 0xac4   :  { %v2615_v51 = vadd.f32 %v2607_v44, %v5042_v17 }
 0xac6   :  { %2621 = vrot.lane.b32.xlu0 %v2615_v51, %s4077_s5 }
 0xac7   :  { %v2609_v40 = vpop.permute.xlu0 %2608 }
 0xac8   :  { %v2616_v32 = vadd.f32 %v2609_v40, %v5056_v25 }
 0xaca   :  { %2623 = vrot.lane.b32.xlu1 %v2616_v32, %s4077_s5 }
 0xacb   :  { %v2611_v20 = vpop.permute.xlu1 %2610 }
 0xacc   :  { %v2617_v39 = vadd.f32 %v2611_v20, %v5082_v57 }
 0xace   :  { %2625 = vrot.lane.b32.xlu0 %v2617_v39, %s4077_s5 }
 0xb38   :  { %v2622_v33 = vpop.permute.xlu0 %2621 }
 0xb39   :  { %v2630_v42 = vsel %vm70_vm1, %v2622_v33, 0.0 }
 0xb3a   :  { %2631 = vadd.xlane.f32.xlu1 %v2630_v42 }
 0xb3c   :  { %v2624_v4 = vpop.permute.xlu1 %2623 }
 0xb3d   :  { %v2633_v18 = vsel %vm70_vm1, %v2624_v4, 0.0 }
 0xb3e   :  { %2634 = vadd.xlane.f32.xlu0 %v2633_v18  ;;  %v3769_v18 = vpack.c.bf16 %v5054_v43, %v5049_v62 }
 0xb40   :  { %v2626_v17 = vpop.permute.xlu0 %2625  ;;  %3770 = vmatpush3.bf16.msra.mxu1 %v3769_v18 }
 0xb41   :  { %v2636_v61 = vsel %vm70_vm1, %v2626_v17, 0.0  ;;  %3771 = vmatprep.subr.bf16.mxu1 %v4074_v0 }
 0xb42   :  { %2637 = vadd.xlane.f32.xlu0 %v2636_v61 }
 0xbc7   :  { %v2632_v25 = vpop.xlane.xlu1 %2631 }
 0xbc8   :  { %v2639_v5 = vmul.f32 0.03125, %v2632_v25  ;;  %v3772_v25 = vpack.c.bf16 %v5070_v36, %v5065_v53  ;;  %v3778_v53 = vpack.c.bf16 %v5099_v35, %v5094_v23  ;;  %v2370_v23 = vld [vmem:[%s5313_s4 + $0x50] sm:$0xff]  ;;  %v2371_v35 = vld [vmem:[%s5313_s4 + $0x58] sm:$0xff] }
 0xbca   :  { %v2642_v50 = vsub.f32 %v2615_v51, %v2639_v5  ;;  %3773 = vmatpush3.bf16.msra.mxu1 %v3772_v25 }
 0xbcb   :  { %v2635_v48 = vpop.xlane.xlu0 %2634  ;;  %3774 = vmatprep.subr.bf16.mxu1 %v4074_v0 }
 0xbcc   :  { %v2645_v41 = vmul.f32 %v2642_v50, %v2642_v50  ;;  %v2640_v57 = vmul.f32 0.03125, %v2635_v48 }
 0xbce   :  { %v2643_v13 = vsub.f32 %v2616_v32, %v2640_v57  ;;  %2651 = vrot.lane.b32.xlu1 %v2645_v41, %s4077_s5 }
 0xbcf   :  { %v2638_v49 = vpop.xlane.xlu0 %2637 }
 0xbd0   :  { %v2646_v21 = vmul.f32 %v2643_v13, %v2643_v13  ;;  %v2641_v14 = vmul.f32 0.03125, %v2638_v49 }
 0xbd2   :  { %v2644_v26 = vsub.f32 %v2617_v39, %v2641_v14  ;;  %2653 = vrot.lane.b32.xlu0 %v2646_v21, %s4077_s5  ;;  %v3784_v21 = vpack.c.bf16 %v2371_v35, %v2370_v23  ;;  %v2372_v14 = vld [vmem:[%s5313_s4 + $0x60] sm:$0xff] }
 0xbd4   :  { %v2647_v31 = vmul.f32 %v2644_v26, %v2644_v26 }
 0xbd6   :  { %2655 = vrot.lane.b32.xlu1 %v2647_v31, %s4077_s5 }
 0xc40   :  { %v2652_v11 = vpop.permute.xlu1 %2651 }
 0xc41   :  { %v2660_v3 = vsel %vm70_vm1, %v2652_v11, 0.0 }
 0xc42   :  { %2661 = vadd.xlane.f32.xlu1 %v2660_v3 }
 0xc44   :  { %v2654_v2 = vpop.permute.xlu0 %2653 }
 0xc45   :  { %v2663_v38 = vsel %vm70_vm1, %v2654_v2, 0.0 }
 0xc46   :  { %2664 = vadd.xlane.f32.xlu0 %v2663_v38  ;;  %v2374_v38 = vld [vmem:[%s5313_s4 + $0x70] sm:$0xff] }
 0xc48   :  { %v2656_v24 = vpop.permute.xlu1 %2655 }
 0xc49   :  { %v2666_v60 = vsel %vm70_vm1, %v2656_v24, 0.0 }
 0xc4a   :  { %2667 = vadd.xlane.f32.xlu0 %v2666_v60  ;;  %v5222_v60 = vld [vmem:[#allocation2 + $0x8] sm:$0xff] }
 0xc4b   :  { %v2706_v9 = vrot.slane %v5222_v60, %v4266_v55 }
 0xc53   :  { %2686 = vrot.lane.b32.xlu1 %v2684_v59, %s4077_s5 }
 0xc60   :  { %2697 = vrot.lane.b32.xlu0 %v2695_v34, %s4077_s5 }
 0xccf   :  { %v2662_v29 = vpop.xlane.xlu1 %2661 }
 0xcd0   :  { %v2669_v27 = vmul.f32 0.03125, %v2662_v29 }
 0xcd2   :  { %v2672_v58 = vadd.f32 1e-05, %v2669_v27 }
 0xcd3   :  { %v2665_v12 = vpop.xlane.xlu0 %2664  ;;  %v2687_v33 = vpop.permute.xlu1 %2686 }
 0xcd4   :  { %4001 = vrsqrt.f32 %v2672_v58  ;;  %v2670_v44 = vmul.f32 0.03125, %v2665_v12  ;;  %v2808_v58 = vrot.slane %v5222_v60, %v2378_v30 }
 0xcd6   :  { %v2673_v51 = vadd.f32 1e-05, %v2670_v44 }
 0xcd7   :  { %v2668_v40 = vpop.xlane.xlu0 %2667 }
 0xcd8   :  { %4003 = vrsqrt.f32 %v2673_v51  ;;  %v2671_v32 = vmul.f32 0.03125, %v2668_v40 }
 0xcda   :  { %v2674_v20 = vadd.f32 1e-05, %v2671_v32 }
 0xcdb   :  { %v2698_v4 = vpop.permute.xlu0 %2697 }
 0xcdc   :  { %4005 = vrsqrt.f32 %v2674_v20 }
 0xcde   :  { %v4002_v39 = vpop.eup %4001 }
 0xcdf   :  { %v2678_v42 = vmul.f32 %v4002_v39, %v2642_v50  ;;  %v3775_v50 = vpack.c.bf16 %v5080_v37, %v5075_v46  ;;  %v2369_v46 = vld [vmem:[%s5313_s4 + $0x48] sm:$0xff] }
 0xce1   :  { %v2689_v17 = vmul.f32 %v2687_v33, %v2678_v42  ;;  %3776 = vmatpush3.bf16.msra.mxu1 %v3775_v50 }
 0xce2   :  { %v4004_v61 = vpop.eup %4003  ;;  %3777 = vmatprep.subr.bf16.mxu1 %v4074_v0 }
 0xce3   :  { %v2679_v5 = vmul.f32 %v4004_v61, %v2643_v13  ;;  %v2700_v48 = vadd.f32 %v2698_v4, %v2689_v17  ;;  %v2368_v13 = vld [vmem:[%s5313_s4 + $0x40] sm:$0xff] }
 0xce4   :  { %v3781_v37 = vpack.c.bf16 %v2369_v46, %v2368_v13 }
 0xce5   :  { %v2690_v41 = vmul.f32 %v2687_v33, %v2679_v5  ;;  %2710 = vrot.lane.b32.xlu1 %v2700_v48, %s4077_s5  ;;  %3779 = vmatpush3.bf16.msra.mxu1 %v3778_v53 }
 0xce6   :  { %v4006_v57 = vpop.eup %4005  ;;  %3780 = vmatprep.subr.bf16.mxu1 %v4074_v0 }
 0xce7   :  { %v2680_v49 = vmul.f32 %v4006_v57, %v2644_v26  ;;  %v2701_v62 = vadd.f32 %v2698_v4, %v2690_v41  ;;  %v2373_v26 = vld [vmem:[%s5313_s4 + $0x68] sm:$0xff] }
 0xce8   :  { %v3787_v31 = vpack.c.bf16 %v2373_v26, %v2372_v14 }
 0xce9   :  { %v2691_v43 = vmul.f32 %v2687_v33, %v2680_v49  ;;  %2712 = vrot.lane.b32.xlu1 %v2701_v62, %s4077_s5  ;;  %3782 = vmatpush3.bf16.msra.mxu1 %v3781_v37 }
 0xcea   :  { %3783 = vmatprep.subr.bf16.mxu1 %v4074_v0 }
 0xceb   :  { %v2702_v36 = vadd.f32 %v2698_v4, %v2691_v43 }
 0xced   :  { %2714 = vrot.lane.b32.xlu0 %v2702_v36, %s4077_s5  ;;  %3785 = vmatpush3.bf16.msra.mxu1 %v3784_v21 }
 0xcee   :  { %3786 = vmatprep.subr.bf16.mxu1 %v4074_v0 }
 0xcf1   :  { %3788 = vmatpush3.bf16.msra.mxu1 %v3787_v31 }
 0xcf2   :  { %3789 = vmatprep.subr.bf16.mxu1 %v4074_v0  ;;  %v2375_v0 = vld [vmem:[%s5313_s4 + $0x78] sm:$0xff]  ;;  %s4087_s4 = smov [#allocation5]  }
 0xcf3   :  { %v3790_v24 = vpack.c.bf16 %v2375_v0, %v2374_v38 }
 0xcf5   :  { %3791 = vmatpush3.bf16.msra.mxu1 %v3790_v24 }
 0xd57   :  { %v2711_v11 = vpop.permute.xlu1 %2710 }
 0xd58   :  { %3611 = vmatmul.mubr.msk.f32.vlgmr.msra.gmra.mrb[66].mxu0 %vm70_vm1, %v2711_v11 }
 0xd59   :  { %3613 = vmatprep.mubr.msk.f32.mxu0 %vm4076_vm0, %v4075_v1 }
 0xd5b   :  { %v2713_v3 = vpop.permute.xlu1 %2712 }
 0xd5c   :  { %3614 = vmatmul.mubr.msk.f32.gmra.mrb[68].mxu0 %vm70_vm1, %v2713_v3 }
 0xd5d   :  { %3616 = vmatprep.mubr.msk.f32.mxu0 %vm4076_vm0, %v4075_v1 }
 0xd5f   :  { %v2715_v2 = vpop.permute.xlu0 %2714 }
 0xd60   :  { %3617 = vmatmul.mubr.msk.f32.gmra.mrb[70].mxu0 %vm70_vm1, %v2715_v2 }
 0xe2b   :  { %v2788_v59 = vpop.f32.mrb[66].mxu0 }
 0xe2c   :  { %v2789_v15 = vadd.f32 %v2788_v59, %v2706_v9  ;;  %v3612_v34 = vpop.f32.mrb[67].mxu0 }
 0xe2e   :  { %v2802_v16 = vmax.f32 %v2789_v15, 0.0 }
 0xe2f   :  { %v2793_v45 = vpop.f32.mrb[68].mxu0 }
 0xe30   :  { %v2794_v28 = vadd.f32 %v2793_v45, %v2706_v9  ;;  %v3615_v56 = vpop.f32.mrb[69].mxu0  ;;  %3652 = vmatmul.mubr.f32.vlgmr.msra.gmra.mrb[54].mxu1 %v2802_v16 }
 0xe31   :  { %3654 = vmatprep.mubr.msk.f32.mxu1 %vm4076_vm0, %v4075_v1 }
 0xe32   :  { %v2803_v7 = vmax.f32 %v2794_v28, 0.0 }
 0xe33   :  { %v2798_v8 = vpop.f32.mrb[70].mxu0 }
 0xe34   :  { %v2799_v29 = vadd.f32 %v2798_v8, %v2706_v9  ;;  %v3618_v27 = vpop.f32.mrb[71].mxu0  ;;  %3655 = vmatmul.mubr.f32.gmra.mrb[56].mxu1 %v2803_v7 }
 0xe35   :  { %3657 = vmatprep.mubr.msk.f32.mxu1 %vm4076_vm0, %v4075_v1  ;;  %v3011_v27 = vrot.slane %v5222_v60, %v2332_v10 }
 0xe36   :  { %v2804_v55 = vmax.f32 %v2799_v29, 0.0  ;;  %v3022_v29 = vrot.slane %v5222_v60, %v2343_v6 }
 0xe38   :  { %3658 = vmatmul.mubr.f32.gmra.mrb[58].mxu1 %v2804_v55 }
 0xf03   :  { %v2875_v12 = vpop.f32.mrb[54].mxu1 }
 0xf04   :  { %v2876_v44 = vadd.f32 %v2875_v12, %v2808_v58  ;;  %v3653_v51 = vpop.f32.mrb[55].mxu1 }
 0xf06   :  { %v2889_v40 = vadd.f32 %v4991_v52, %v2876_v44 }
 0xf07   :  { %v2880_v32 = vpop.f32.mrb[56].mxu1 }
 0xf08   :  { %v2881_v20 = vadd.f32 %v2880_v32, %v2808_v58  ;;  %2948 = vrot.lane.b32.xlu1 %v2889_v40, %s4078_s15  ;;  %v3656_v39 = vpop.f32.mrb[57].mxu1  ;;  %v2892_v48 = vsel %vm70_vm1, %v2889_v40, 0.0 }
 0xf0a   :  { %v2890_v33 = vadd.f32 %v4998_v63, %v2881_v20 }
 0xf0b   :  { %v2885_v42 = vpop.f32.mrb[58].mxu1 }
 0xf0c   :  { %v2886_v1 = vadd.f32 %v2885_v42, %v2808_v58  ;;  %2950 = vrot.lane.b32.xlu0 %v2890_v33, %s4078_s15  ;;  %v3659_v4 = vpop.f32.mrb[59].mxu1  ;;  %v2895_v5 = vsel %vm70_vm1, %v2890_v33, 0.0 }
 0xf0e   :  { %v2891_v18 = vadd.f32 %v5005_v19, %v2886_v1 }
 0xf10   :  { %2952 = vrot.lane.b32.xlu1 %v2891_v18, %s4078_s15  ;;  %v2898_v19 = vsel %vm70_vm1, %v2891_v18, 0.0 }
 0xf7a   :  { %v2949_v30 = vpop.permute.xlu1 %2948 }
 0xf7b   :  { %v2957_v17 = vsel %vm70_vm1, %v2949_v30, 0.0 }
 0xf7c   :  { %2958 = vadd.xlane.f32.xlu0 %v2957_v17 }
 0xf7e   :  { %v2951_v52 = vpop.permute.xlu0 %2950 }
 0xf7f   :  { %v2960_v61 = vsel %vm70_vm1, %v2951_v52, 0.0 }
 0xf80   :  { %2961 = vadd.xlane.f32.xlu1 %v2960_v61 }
 0xf82   :  { %v2953_v25 = vpop.permute.xlu1 %2952 }
 0xf83   :  { %v2963_v63 = vsel %vm70_vm1, %v2953_v25, 0.0 }
 0xf84   :  { %2896 = vadd.xlane.f32.xlu1 %v2895_v5  ;;  %2964 = vadd.xlane.f32.xlu0 %v2963_v63  ;;  %v2934_v63 = vrot.slane %v5222_v60, %v2246_v47 }
 0xf88   :  { %2893 = vadd.xlane.f32.xlu0 %v2892_v48 }
 0xf8c   :  { %2899 = vadd.xlane.f32.xlu0 %v2898_v19 }
0x1009   :  { %v2959_v41 = vpop.xlane.xlu0 %2958 }
0x100a   :  { %v2966_v57 = vmul.f32 0.03125, %v2959_v41 }
0x100c   :  { %v5245_v50 = vsub.f32 %v2889_v40, %v2966_v57 }
0x100d   :  { %v2962_v49 = vpop.xlane.xlu1 %2961 }
0x100e   :  { %v2972_v62 = vmul.f32 %v5245_v50, %v5245_v50  ;;  %v2967_v43 = vmul.f32 0.03125, %v2962_v49 }
0x1010   :  { %v5249_v53 = vsub.f32 %v2890_v33, %v2967_v43  ;;  %2978 = vrot.lane.b32.xlu1 %v2972_v62, %s4078_s15  ;;  %v2941_v43 = vrot.slane %v5222_v60, %v2480_v22 }
0x1011   :  { %v2965_v36 = vpop.xlane.xlu0 %2964  ;;  %v2897_v21 = vpop.xlane.xlu1 %2896 }
0x1012   :  { %v2973_v13 = vmul.f32 %v5249_v53, %v5249_v53  ;;  %v2968_v46 = vmul.f32 0.03125, %v2965_v36  ;;  %v2902_v14 = vmul.f32 0.03125, %v2897_v21 }
0x1014   :  { %v5254_v37 = vsub.f32 %v2891_v18, %v2968_v46  ;;  %2980 = vrot.lane.b32.xlu0 %v2973_v13, %s4078_s15  ;;  %v2905_v31 = vsub.f32 %v2890_v33, %v2902_v14 }
0x1015   :  { %v2894_v35 = vpop.xlane.xlu0 %2893 }
0x1016   :  { %v2974_v23 = vmul.f32 %v5254_v37, %v5254_v37  ;;  %v2908_v2 = vmul.f32 %v2905_v31, %v2905_v31  ;;  %v2901_v38 = vmul.f32 0.03125, %v2894_v35 }
0x1018   :  { %2982 = vrot.lane.b32.xlu1 %v2974_v23, %s4078_s15  ;;  %v2913_v0 = vsel %vm70_vm1, %v2908_v2, 0.0  ;;  %v2904_v9 = vsub.f32 %v2889_v40, %v2901_v38  ;;  %s3044_s15 = sshll.u32 %s4087_s4, 4  ;;  %s3045_s15 = int_to_ptr.vmem [resolvable:$true] %s3044_s15 }
0x1019   :  { %v2900_v26 = vpop.xlane.xlu0 %2899  ;;  %p4050_p9 = scmp.lt.s32.totalorder %s3045_s15, %s3045_s15 }
0x101a   :  { %v2903_v11 = vmul.f32 0.03125, %v2900_v26  ;;  %v2907_v15 = vmul.f32 %v2904_v9, %v2904_v9 }
0x101c   :  { %v5260_v3 = vsub.f32 %v2891_v18, %v2903_v11  ;;  %v2910_v34 = vsel %vm70_vm1, %v2907_v15, 0.0 }
0x101e   :  { %v2909_v24 = vmul.f32 %v5260_v3, %v5260_v3 }
0x1020   :  { %v2916_v59 = vsel %vm70_vm1, %v2909_v24, 0.0 }
0x1033   :  { %2914 = vadd.xlane.f32.xlu0 %v2913_v0 }
0x1037   :  { %2917 = vadd.xlane.f32.xlu0 %v2916_v59 }
0x103c   :  { %2911 = vadd.xlane.f32.xlu1 %v2910_v34 }
0x1082   :  { %v2979_v16 = vpop.permute.xlu1 %2978 }
0x1083   :  { %v2987_v45 = vsel %vm70_vm1, %v2979_v16, 0.0 }
0x1084   :  { %2988 = vadd.xlane.f32.xlu1 %v2987_v45 }
0x1086   :  { %v2981_v28 = vpop.permute.xlu0 %2980 }
0x1087   :  { %v2990_v56 = vsel %vm70_vm1, %v2981_v28, 0.0 }
0x1088   :  { %2991 = vadd.xlane.f32.xlu0 %v2990_v56 }
0x108a   :  { %v2983_v7 = vpop.permute.xlu1 %2982 }
0x108b   :  { %v2993_v8 = vsel %vm70_vm1, %v2983_v7, 0.0 }
0x108c   :  { %2994 = vadd.xlane.f32.xlu1 %v2993_v8 }
0x109d   :  { %3024 = vrot.lane.b32.xlu1 %v3022_v29, %s4086_s29 }
0x109e   :  { %3013 = vrot.lane.b32.xlu0 %v3011_v27, %s4086_s29  ;;  %s4045_s29 = scalar_lea.vmem %s3045_s15, 384 }
0x109f   :  { %p4046_p8 = scmp.ne.s32.totalorder %s3045_s15, %s4045_s29  ;;  %p4051_p10 = scmp.lt.s32.totalorder %s4045_s29, %s4045_s29 }
0x10a1   :  { %p4052_p11 = por %p4051_p10, %p4050_p9 }
0x10a3   :  { %p4053_p12 = pnand %p4052_p11, %p4046_p8 }
0x10c0   :  { %v2915_v58 = vpop.xlane.xlu0 %2914 }
0x10c1   :  { %v2920_v44 = vmul.f32 0.03125, %v2915_v58 }
0x10c3   :  { %v2923_v32 = vadd.f32 1e-05, %v2920_v44 }
0x10c4   :  { %v2918_v40 = vpop.xlane.xlu0 %2917 }
0x10c5   :  { %v2921_v20 = vmul.f32 0.03125, %v2918_v40 }
0x10c7   :  { %v2924_v6 = vadd.f32 1e-05, %v2921_v20 }
0x10c9   :  { %v2912_v55 = vpop.xlane.xlu1 %2911 }
0x10ca   :  { %v2919_v12 = vmul.f32 0.03125, %v2912_v55 }
0x10cc   :  { %v2922_v51 = vadd.f32 1e-05, %v2919_v12 }
0x10ce   :  { %4007 = vrsqrt.f32 %v2922_v51 }
0x10cf   :  { %4009 = vrsqrt.f32 %v2923_v32 }
0x10d8   :  { %v4008_v30 = vpop.eup %4007 }
0x10d9   :  { %v4010_v61 = vpop.eup %4009  ;;  %v2928_v25 = vmul.f32 %v4008_v30, %v2904_v9 }
0x10da   :  { %v2929_v48 = vmul.f32 %v4010_v61, %v2905_v31 }
0x10db   :  { %v2935_v57 = vmul.f32 %v2934_v63, %v2928_v25 }
0x10dc   :  { %v2936_v46 = vmul.f32 %v2934_v63, %v2929_v48 }
0x10dd   :  { %v2942_v47 = vadd.f32 %v2941_v43, %v2935_v57 }
0x10de   :  { %v2943_v2 = vadd.f32 %v2941_v43, %v2936_v46 }
0x1111   :  { %v2989_v39 = vpop.xlane.xlu1 %2988 }
0x1112   :  { %v2996_v33 = vmul.f32 0.03125, %v2989_v39 }
0x1114   :  { %v2999_v42 = vadd.f32 1e-05, %v2996_v33 }
0x1115   :  { %v2992_v1 = vpop.xlane.xlu0 %2991 }
0x1116   :  { %4011 = vrsqrt.f32 %v2999_v42  ;;  %v2997_v10 = vmul.f32 0.03125, %v2992_v1 }
0x1117   :  { %4013 = vrsqrt.f32 %v2924_v6 }
0x1118   :  { %v3000_v4 = vadd.f32 1e-05, %v2997_v10 }
0x1119   :  { %v2995_v18 = vpop.xlane.xlu1 %2994  ;;  %v3014_v19 = vpop.permute.xlu0 %3013 }
0x111a   :  { %4015 = vrsqrt.f32 %v3000_v4  ;;  %v2998_v17 = vmul.f32 0.03125, %v2995_v18 }
0x111c   :  { %v3001_v52 = vadd.f32 1e-05, %v2998_v17 }
0x111d   :  { %v3025_v62 = vpop.permute.xlu1 %3024 }
0x111e   :  { %4017 = vrsqrt.f32 %v3001_v52 }
0x1120   :  { %v4012_v5 = vpop.eup %4011 }
0x1121   :  { %v3005_v41 = vmul.f32 %v4012_v5, %v5245_v50  ;;  %v4014_v49 = vpop.eup %4013 }
0x1122   :  { %v2930_v23 = vmul.f32 %v4014_v49, %v5260_v3 }
0x1123   :  { %v3016_v36 = vmul.f32 %v3014_v19, %v3005_v41 }
0x1124   :  { %v4016_v13 = vpop.eup %4015  ;;  %v2937_v54 = vmul.f32 %v2934_v63, %v2930_v23 }
0x1125   :  { %v3006_v35 = vmul.f32 %v4016_v13, %v5249_v53  ;;  %v3027_v21 = vadd.f32 %v3025_v62, %v3016_v36 }
0x1126   :  { %v2944_v53 = vadd.f32 %v2941_v43, %v2937_v54 }
0x1127   :  { %v3017_v14 = vmul.f32 %v3014_v19, %v3006_v35  ;;  %v3030_v26 = vsel %vm70_vm1, %v2942_v47, %v3027_v21 }
0x1128   :  { %v4018_v50 = vpop.eup %4017  ;;  %v3033_v31 = vsel %vm98_vm2, %v3030_v26, 0.0 }
0x1129   :  { %v3007_v11 = vmul.f32 %v4018_v50, %v5254_v37  ;;  %v3028_v22 = vadd.f32 %v3025_v62, %v3017_v14  ;;  %3036 = vst [vmem:[#allocation5] sm:$0xff] %v3033_v31 }
0x112b   :  { %v3018_v60 = vmul.f32 %v3014_v19, %v3007_v11  ;;  %v3031_v38 = vsel %vm70_vm1, %v2943_v2, %v3028_v22 }
0x112c   :  { %v3034_v3 = vsel %vm98_vm2, %v3031_v38, 0.0 }
0x112d   :  { %v3029_v0 = vadd.f32 %v3025_v62, %v3018_v60  ;;  %3037 = vst [vmem:[#allocation5 + $0x8] sm:$0xff] %v3034_v3 }
0x112f   :  { %v3032_v24 = vsel %vm70_vm1, %v2944_v53, %v3029_v0 }
0x1130   :  { %v3035_v9 = vsel %vm98_vm2, %v3032_v24, 0.0 }
0x1131   :  { %3038 = vst [vmem:[#allocation5 + $0x10] sm:$0xff] %v3035_v9 }
0x1132   :  { %4056 = shalt.err (!%p4053_p12)
}
0x1133   :  { %s4057_s17 = scalar_lea.hbm %s5315_s6, 384 }
0x1134   :  { %p4058_p13 = scmp.ne.s32.totalorder %s5315_s6, %s4057_s17  ;;  %p4061_p0 = scmp.lt.u32.totalorder %s4057_s17, %s5315_s6 }
0x1136   :  { %p4063_p1 = pnand %p4061_p0, %p4058_p13 }
0x1138   :  { %4066 = shalt.err (!%p4063_p1)
}
0x1139   :  { %3050 = dma.vmem_to_hbm [thread:$0]  %s3045_s15, 384, %s5315_s6, [#allocation4], %s4072_s7, %s4072_s7, %s4073_s8  }
0x113a   :  { %4069 = dma.done.wait [#allocation4], 384  }
0x113b   :  { %4070 = vsyncadd [#allocation4], 4294966912 }
0x113c   :  { %3054 = vsyncpa [#allocation3], 1 }
0x113d   :  { %3055 = vsyncpa [#allocation4], 1 }

</bundles_post_ra>
